<compile_context>
chip_gen: v5e
topology: v5e:2x2
jax: 0.10.0
libtpu: 0.0.40
codegen_flags: <defaults>
</compile_context>

<pallas_src>
import math

import jax
import jax.numpy as jnp
from jax.experimental import pallas as pl
from jax.experimental.pallas import tpu as pltpu

# ----- small synthetic config (consistent with the module's forward) -----
B = 2          # batch (number of prompts)
S = 8          # sequence length (context length)
D = 32         # transformer width
H = 4          # attention heads
DH = D // H    # head dim
DFF = 4 * D    # MLP hidden
L = 2          # transformer layers
P = 16         # text projection (embed) dim
EPS = 1e-5
NEG_INF = -1e30


# ---------------------------------------------------------------------------
# Fused kernel
# ---------------------------------------------------------------------------
def _layernorm(x, g, b):
    mu = jnp.mean(x, axis=-1, keepdims=True)
    var = jnp.mean(jnp.square(x - mu), axis=-1, keepdims=True)
    return (x - mu) * jax.lax.rsqrt(var + EPS) * g + b


def _text_encoder_kernel(eot_ref,                       # (B,) int32 in SMEM
                         prompts_ref, pos_ref,          # (B,S,D), (S,D)
                         ln1_g_ref, ln1_b_ref,          # (L,1,D) each
                         wqkv_ref, bqkv_ref,            # (L,D,3D), (L,1,3D)
                         wo_ref, bo_ref,                # (L,D,D),  (L,1,D)
                         ln2_g_ref, ln2_b_ref,          # (L,1,D) each
                         w1_ref, b1_ref,                # (L,D,DFF), (L,1,DFF)
                         w2_ref, b2_ref,                # (L,DFF,D), (L,1,D)
                         lnf_g_ref, lnf_b_ref,          # (1,D) each
                         proj_ref,                      # (D,P)
                         o_ref):                        # (B,P) output
    # x = prompts + positional_embedding ; flatten to a lane/sublane-friendly slab.
    x3 = prompts_ref[...] + pos_ref[...][None, :, :]          # (B, S, D)
    x = x3.reshape(B * S, D)                                  # (B*S, D)

    # Causal mask — built ONCE, reused by every layer (no per-layer iota re-emit).
    row = jax.lax.broadcasted_iota(jnp.int32, (S, S), 0)
    col = jax.lax.broadcasted_iota(jnp.int32, (S, S), 1)
    causal = (row >= col)[None, :, :]                         # (1, S, S), allow j <= i

    scale = 1.0 / math.sqrt(DH)

    for l in range(L):   # static unroll; all layer weights already resident in VMEM
        # ---------------- attention block ----------------
        h = _layernorm(x, ln1_g_ref[l], ln1_b_ref[l])         # (B*S, D)
        # One fused QKV matmul over the whole (B*S, D) slab.
        qkv = jnp.dot(h, wqkv_ref[l],
                      preferred_element_type=jnp.float32) + bqkv_ref[l]  # (B*S, 3D)
        qkv3 = qkv.reshape(B, S, 3 * D)

        heads = []
        for hh in range(H):                                   # static; batched over B
            q = qkv3[:, :, hh * DH:(hh + 1) * DH]             # (B, S, DH)
            k = qkv3[:, :, D + hh * DH:D + (hh + 1) * DH]
            v = qkv3[:, :, 2 * D + hh * DH:2 * D + (hh + 1) * DH]
            s = jnp.einsum('bqd,bkd->bqk', q, k,
                           preferred_element_type=jnp.float32) * scale   # (B, S, S)
            s = jnp.where(causal, s, NEG_INF)
            m = jnp.max(s, axis=-1, keepdims=True)
            e = jnp.exp(s - m)
            p = e * pl.reciprocal(jnp.sum(e, axis=-1, keepdims=True), approx=True)
            heads.append(jnp.einsum('bqk,bkd->bqd', p, v,
                                    preferred_element_type=jnp.float32))  # (B, S, DH)
        attn = jnp.concatenate(heads, axis=-1).reshape(B * S, D)

        y = jnp.dot(attn, wo_ref[l],
                    preferred_element_type=jnp.float32) + bo_ref[l]
        x = x + y                                             # residual

        # ---------------- MLP block ----------------
        h = _layernorm(x, ln2_g_ref[l], ln2_b_ref[l])
        u = jnp.dot(h, w1_ref[l],
                    preferred_element_type=jnp.float32) + b1_ref[l]       # (B*S, DFF)
        u = u * jax.nn.sigmoid(1.702 * u)                     # QuickGELU
        y = jnp.dot(u, w2_ref[l],
                    preferred_element_type=jnp.float32) + b2_ref[l]
        x = x + y                                             # residual

    # ---------------- ln_final + EOT gather + projection ----------------
    xf = _layernorm(x, lnf_g_ref[...], lnf_b_ref[...])        # (B*S, D)
    seq_iota = jax.lax.broadcasted_iota(jnp.int32, (S, 1), 0)  # hoisted out of b-loop
    rows = []
    for b in range(B):                                        # static unroll over B
        idx = eot_ref[b]                                      # scalar from SMEM
        xb = xf[b * S:(b + 1) * S, :]                         # (S, D) static slice
        sel = jnp.where(seq_iota == idx, xb, 0.0)             # one-hot row select
        rows.append(jnp.sum(sel, axis=0, keepdims=True))      # (1, D)
    eot_x = jnp.concatenate(rows, axis=0)                     # (B, D)
    o_ref[...] = jnp.dot(eot_x, proj_ref[...],
                         preferred_element_type=jnp.float32)  # (B, P)


# ---------------------------------------------------------------------------
# pallas_call wrapper — ONE call, no grid, everything resident in VMEM
# ---------------------------------------------------------------------------
def text_encoder(params, prompts, tokenized_prompts):
    # tokenized_prompts.argmax(-1): tiny integer preprocessing, done in plain JAX,
    # result passed into the kernel through SMEM.
    eot_idx = jnp.argmax(tokenized_prompts, axis=-1).astype(jnp.int32)

    smem = pl.BlockSpec(memory_space=pltpu.MemorySpace.SMEM)
    vmem = pl.BlockSpec(memory_space=pltpu.MemorySpace.VMEM)

    return pl.pallas_call(
        _text_encoder_kernel,
        out_shape=jax.ShapeDtypeStruct((B, P), jnp.float32),
        in_specs=[smem] + [vmem] * 17,
        out_specs=vmem,
    )(eot_idx, prompts, params["pos"],
      params["ln1_g"], params["ln1_b"], params["wqkv"], params["bqkv"],
      params["wo"], params["bo"],
      params["ln2_g"], params["ln2_b"], params["w1"], params["b1"],
      params["w2"], params["b2"],
      params["lnf_g"], params["lnf_b"], params["proj"])


# ---------------------------------------------------------------------------
# Parameters (deterministic synthetic init, stacked per layer — no checkpoint)
# ---------------------------------------------------------------------------
def init_params(key):
    keys = iter(jax.random.split(key, 16))
    nrm = lambda shape, s=0.02: s * jax.random.normal(next(keys), shape, jnp.float32)
    return dict(
        pos=nrm((S, D)),
        ln1_g=jnp.ones((L, 1, D), jnp.float32),
        ln1_b=jnp.zeros((L, 1, D), jnp.float32),
        wqkv=nrm((L, D, 3 * D)),
        bqkv=nrm((L, 1, 3 * D)),
        wo=nrm((L, D, D)),
        bo=nrm((L, 1, D)),
        ln2_g=jnp.ones((L, 1, D), jnp.float32),
        ln2_b=jnp.zeros((L, 1, D), jnp.float32),
        w1=nrm((L, D, DFF)),
        b1=nrm((L, 1, DFF)),
        w2=nrm((L, DFF, D)),
        b2=nrm((L, 1, D)),
        lnf_g=jnp.ones((1, D), jnp.float32),
        lnf_b=jnp.zeros((1, D), jnp.float32),
        proj=nrm((D, P)),
    )


if __name__ == "__main__":
    key = jax.random.PRNGKey(0)
    k_param, k_prompt, k_tok = jax.random.split(key, 3)

    params = init_params(k_param)
    prompts = jax.random.normal(k_prompt, (B, S, D), jnp.float32)
    tokenized_prompts = jax.random.randint(k_tok, (B, S), 0, 1000, jnp.int32)

    out = text_encoder(params, prompts, tokenized_prompts)
    out = jax.block_until_ready(out)
    assert out.shape == (B, P) and out.dtype == jnp.float32
    print("KERNEL_OK")
</pallas_src>

<mosaic_0001>
module attributes {stable_mosaic.version = 11 : i64} {
  func.func @_text_encoder_kernel(%arg0: memref<2xi32, #tpu.memory_space<smem>>, %arg1: memref<2x8x32xf32, #tpu.memory_space<vmem>>, %arg2: memref<8x32xf32, #tpu.memory_space<vmem>>, %arg3: memref<2x1x32xf32, #tpu.memory_space<vmem>>, %arg4: memref<2x1x32xf32, #tpu.memory_space<vmem>>, %arg5: memref<2x32x96xf32, #tpu.memory_space<vmem>>, %arg6: memref<2x1x96xf32, #tpu.memory_space<vmem>>, %arg7: memref<2x32x32xf32, #tpu.memory_space<vmem>>, %arg8: memref<2x1x32xf32, #tpu.memory_space<vmem>>, %arg9: memref<2x1x32xf32, #tpu.memory_space<vmem>>, %arg10: memref<2x1x32xf32, #tpu.memory_space<vmem>>, %arg11: memref<2x32x128xf32, #tpu.memory_space<vmem>>, %arg12: memref<2x1x128xf32, #tpu.memory_space<vmem>>, %arg13: memref<2x128x32xf32, #tpu.memory_space<vmem>>, %arg14: memref<2x1x32xf32, #tpu.memory_space<vmem>>, %arg15: memref<1x32xf32, #tpu.memory_space<vmem>>, %arg16: memref<1x32xf32, #tpu.memory_space<vmem>>, %arg17: memref<32x16xf32, #tpu.memory_space<vmem>>, %arg18: memref<2x16xf32, #tpu.memory_space<vmem>>) attributes {dimension_semantics = [], scalar_prefetch = 0 : i64, scratch_operands = 0 : i64, tpu.core_type = #tpu.core_type<tc>} {
    %c0 = arith.constant 0 : index
    %c0_0 = arith.constant 0 : index
    %c0_1 = arith.constant 0 : index
    %0 = vector.load %arg1[%c0, %c0_0, %c0_1] : memref<2x8x32xf32, #tpu.memory_space<vmem>>, vector<2x8x32xf32>
    %c0_2 = arith.constant 0 : index
    %c0_3 = arith.constant 0 : index
    %1 = vector.load %arg2[%c0_2, %c0_3] : memref<8x32xf32, #tpu.memory_space<vmem>>, vector<8x32xf32>
    %2 = vector.shape_cast %1 : vector<8x32xf32> to vector<1x8x32xf32>
    %3 = vector.broadcast %2 : vector<1x8x32xf32> to vector<2x8x32xf32>
    %4 = arith.addf %0, %3 : vector<2x8x32xf32>
    %5 = vector.shape_cast %4 : vector<2x8x32xf32> to vector<16x32xf32>
    %6 = tpu.iota {dimensions = array<i32: 0>} : vector<8x8xi32>
    %7 = tpu.iota {dimensions = array<i32: 1>} : vector<8x8xi32>
    %8 = arith.cmpi sge, %6, %7 : vector<8x8xi32>
    %9 = vector.shape_cast %8 : vector<8x8xi1> to vector<1x8x8xi1>
    %c0_4 = arith.constant 0 : index
    %c0_5 = arith.constant 0 : index
    %c0_6 = arith.constant 0 : index
    %10 = vector.load %arg3[%c0_4, %c0_5, %c0_6] : memref<2x1x32xf32, #tpu.memory_space<vmem>>, vector<1x1x32xf32>
    %11 = vector.shape_cast %10 : vector<1x1x32xf32> to vector<1x32xf32>
    %c0_7 = arith.constant 0 : index
    %c0_8 = arith.constant 0 : index
    %c0_9 = arith.constant 0 : index
    %12 = vector.load %arg4[%c0_7, %c0_8, %c0_9] : memref<2x1x32xf32, #tpu.memory_space<vmem>>, vector<1x1x32xf32>
    %13 = vector.shape_cast %12 : vector<1x1x32xf32> to vector<1x32xf32>
    %cst = arith.constant dense<0.000000e+00> : vector<16xf32>
    %14 = vector.multi_reduction <add>, %5, %cst [1] : vector<16x32xf32> to vector<16xf32>
    %15 = vector.shape_cast %14 : vector<16xf32> to vector<16x1xf32>
    %cst_10 = arith.constant 3.200000e+01 : f32
    %16 = vector.broadcast %cst_10 : f32 to vector<16x1xf32>
    %17 = arith.divf %15, %16 : vector<16x1xf32>
    %18 = vector.broadcast %17 : vector<16x1xf32> to vector<16x32xf32>
    %19 = arith.subf %5, %18 : vector<16x32xf32>
    %20 = arith.mulf %19, %19 : vector<16x32xf32>
    %cst_11 = arith.constant dense<0.000000e+00> : vector<16xf32>
    %21 = vector.multi_reduction <add>, %20, %cst_11 [1] : vector<16x32xf32> to vector<16xf32>
    %22 = vector.shape_cast %21 : vector<16xf32> to vector<16x1xf32>
    %cst_12 = arith.constant 3.200000e+01 : f32
    %23 = vector.broadcast %cst_12 : f32 to vector<16x1xf32>
    %24 = arith.divf %22, %23 : vector<16x1xf32>
    %25 = vector.broadcast %17 : vector<16x1xf32> to vector<16x32xf32>
    %26 = arith.subf %5, %25 : vector<16x32xf32>
    %cst_13 = arith.constant 9.99999974E-6 : f32
    %27 = vector.broadcast %cst_13 : f32 to vector<16x1xf32>
    %28 = arith.addf %24, %27 : vector<16x1xf32>
    %29 = math.rsqrt %28 : vector<16x1xf32>
    %30 = vector.broadcast %29 : vector<16x1xf32> to vector<16x32xf32>
    %31 = arith.mulf %26, %30 : vector<16x32xf32>
    %32 = vector.broadcast %11 : vector<1x32xf32> to vector<16x32xf32>
    %33 = arith.mulf %31, %32 : vector<16x32xf32>
    %34 = vector.broadcast %13 : vector<1x32xf32> to vector<16x32xf32>
    %35 = arith.addf %33, %34 : vector<16x32xf32>
    %c0_14 = arith.constant 0 : index
    %c0_15 = arith.constant 0 : index
    %c0_16 = arith.constant 0 : index
    %36 = vector.load %arg5[%c0_14, %c0_15, %c0_16] : memref<2x32x96xf32, #tpu.memory_space<vmem>>, vector<1x32x96xf32>
    %37 = vector.shape_cast %36 : vector<1x32x96xf32> to vector<32x96xf32>
    %cst_17 = arith.constant dense<0.000000e+00> : vector<16x96xf32>
    %38 = tpu.matmul %35, %37, %cst_17 {dimension_numbers = #tpu.dot_dimension_numbers<[1], [0], [0], [1], [0, 0, 1, 1], [], []>} : vector<16x32xf32>, vector<32x96xf32>, vector<16x96xf32> -> vector<16x96xf32>
    %c0_18 = arith.constant 0 : index
    %c0_19 = arith.constant 0 : index
    %c0_20 = arith.constant 0 : index
    %39 = vector.load %arg6[%c0_18, %c0_19, %c0_20] : memref<2x1x96xf32, #tpu.memory_space<vmem>>, vector<1x1x96xf32>
    %40 = vector.shape_cast %39 : vector<1x1x96xf32> to vector<1x96xf32>
    %41 = vector.broadcast %40 : vector<1x96xf32> to vector<16x96xf32>
    %42 = arith.addf %38, %41 : vector<16x96xf32>
    %43 = vector.shape_cast %42 : vector<16x96xf32> to vector<2x8x96xf32>
    %44 = vector.extract_strided_slice %43 {offsets = [0, 0, 0], sizes = [2, 8, 8], strides = [1, 1, 1]} : vector<2x8x96xf32> to vector<2x8x8xf32>
    %45 = vector.extract_strided_slice %43 {offsets = [0, 0, 32], sizes = [2, 8, 8], strides = [1, 1, 1]} : vector<2x8x96xf32> to vector<2x8x8xf32>
    %46 = vector.extract_strided_slice %43 {offsets = [0, 0, 64], sizes = [2, 8, 8], strides = [1, 1, 1]} : vector<2x8x96xf32> to vector<2x8x8xf32>
    "tpu.trace_start"() <{level = 10 : i32, message = "bqd,bkd->bqk"}> : () -> ()
    %cst_21 = arith.constant dense<0.000000e+00> : vector<2x8x8xf32>
    %47 = tpu.matmul %44, %45, %cst_21 {dimension_numbers = #tpu.dot_dimension_numbers<[2], [2], [1], [1], [0, 0, 0, 1, 1, 1], [0], [0]>} : vector<2x8x8xf32>, vector<2x8x8xf32>, vector<2x8x8xf32> -> vector<2x8x8xf32>
    "tpu.trace_stop"() : () -> ()
    %cst_22 = arith.constant 0.353553385 : f32
    %48 = vector.broadcast %cst_22 : f32 to vector<2x8x8xf32>
    %49 = arith.mulf %47, %48 : vector<2x8x8xf32>
    %cst_23 = arith.constant -1.000000e+30 : f32
    %50 = vector.shape_cast %9 : vector<1x8x8xi1> to vector<1x8x8xi1>
    %51 = vector.broadcast %50 : vector<1x8x8xi1> to vector<2x8x8xi1>
    %52 = vector.broadcast %cst_23 : f32 to vector<2x8x8xf32>
    %53 = arith.select %51, %49, %52 : vector<2x8x8xi1>, vector<2x8x8xf32>
    %cst_24 = arith.constant dense<0xFF800000> : vector<2x8xf32>
    %54 = vector.multi_reduction <maximumf>, %53, %cst_24 [2] : vector<2x8x8xf32> to vector<2x8xf32>
    %55 = vector.shape_cast %54 : vector<2x8xf32> to vector<2x8x1xf32>
    %56 = vector.broadcast %55 : vector<2x8x1xf32> to vector<2x8x8xf32>
    %57 = arith.subf %53, %56 : vector<2x8x8xf32>
    %58 = math.exp %57 : vector<2x8x8xf32>
    %cst_25 = arith.constant dense<0.000000e+00> : vector<2x8xf32>
    %59 = vector.multi_reduction <add>, %58, %cst_25 [2] : vector<2x8x8xf32> to vector<2x8xf32>
    %60 = vector.shape_cast %59 : vector<2x8xf32> to vector<2x8x1xf32>
    %61 = tpu.reciprocal %60 {approx = true} : vector<2x8x1xf32> -> vector<2x8x1xf32>
    %62 = vector.broadcast %61 : vector<2x8x1xf32> to vector<2x8x8xf32>
    %63 = arith.mulf %58, %62 : vector<2x8x8xf32>
    "tpu.trace_start"() <{level = 10 : i32, message = "bqk,bkd->bqd"}> : () -> ()
    %cst_26 = arith.constant dense<0.000000e+00> : vector<2x8x8xf32>
    %64 = tpu.matmul %63, %46, %cst_26 {dimension_numbers = #tpu.dot_dimension_numbers<[2], [1], [1], [2], [0, 0, 0, 1, 1, 2], [0], [0]>} : vector<2x8x8xf32>, vector<2x8x8xf32>, vector<2x8x8xf32> -> vector<2x8x8xf32>
    "tpu.trace_stop"() : () -> ()
    %65 = vector.extract_strided_slice %43 {offsets = [0, 0, 8], sizes = [2, 8, 8], strides = [1, 1, 1]} : vector<2x8x96xf32> to vector<2x8x8xf32>
    %66 = vector.extract_strided_slice %43 {offsets = [0, 0, 40], sizes = [2, 8, 8], strides = [1, 1, 1]} : vector<2x8x96xf32> to vector<2x8x8xf32>
    %67 = vector.extract_strided_slice %43 {offsets = [0, 0, 72], sizes = [2, 8, 8], strides = [1, 1, 1]} : vector<2x8x96xf32> to vector<2x8x8xf32>
    "tpu.trace_start"() <{level = 10 : i32, message = "bqd,bkd->bqk"}> : () -> ()
    %cst_27 = arith.constant dense<0.000000e+00> : vector<2x8x8xf32>
    %68 = tpu.matmul %65, %66, %cst_27 {dimension_numbers = #tpu.dot_dimension_numbers<[2], [2], [1], [1], [0, 0, 0, 1, 1, 1], [0], [0]>} : vector<2x8x8xf32>, vector<2x8x8xf32>, vector<2x8x8xf32> -> vector<2x8x8xf32>
    "tpu.trace_stop"() : () -> ()
    %cst_28 = arith.constant 0.353553385 : f32
    %69 = vector.broadcast %cst_28 : f32 to vector<2x8x8xf32>
    %70 = arith.mulf %68, %69 : vector<2x8x8xf32>
    %cst_29 = arith.constant -1.000000e+30 : f32
    %71 = vector.shape_cast %9 : vector<1x8x8xi1> to vector<1x8x8xi1>
    %72 = vector.broadcast %71 : vector<1x8x8xi1> to vector<2x8x8xi1>
    %73 = vector.broadcast %cst_29 : f32 to vector<2x8x8xf32>
    %74 = arith.select %72, %70, %73 : vector<2x8x8xi1>, vector<2x8x8xf32>
    %cst_30 = arith.constant dense<0xFF800000> : vector<2x8xf32>
    %75 = vector.multi_reduction <maximumf>, %74, %cst_30 [2] : vector<2x8x8xf32> to vector<2x8xf32>
    %76 = vector.shape_cast %75 : vector<2x8xf32> to vector<2x8x1xf32>
    %77 = vector.broadcast %76 : vector<2x8x1xf32> to vector<2x8x8xf32>
    %78 = arith.subf %74, %77 : vector<2x8x8xf32>
    %79 = math.exp %78 : vector<2x8x8xf32>
    %cst_31 = arith.constant dense<0.000000e+00> : vector<2x8xf32>
    %80 = vector.multi_reduction <add>, %79, %cst_31 [2] : vector<2x8x8xf32> to vector<2x8xf32>
    %81 = vector.shape_cast %80 : vector<2x8xf32> to vector<2x8x1xf32>
    %82 = tpu.reciprocal %81 {approx = true} : vector<2x8x1xf32> -> vector<2x8x1xf32>
    %83 = vector.broadcast %82 : vector<2x8x1xf32> to vector<2x8x8xf32>
    %84 = arith.mulf %79, %83 : vector<2x8x8xf32>
    "tpu.trace_start"() <{level = 10 : i32, message = "bqk,bkd->bqd"}> : () -> ()
    %cst_32 = arith.constant dense<0.000000e+00> : vector<2x8x8xf32>
    %85 = tpu.matmul %84, %67, %cst_32 {dimension_numbers = #tpu.dot_dimension_numbers<[2], [1], [1], [2], [0, 0, 0, 1, 1, 2], [0], [0]>} : vector<2x8x8xf32>, vector<2x8x8xf32>, vector<2x8x8xf32> -> vector<2x8x8xf32>
    "tpu.trace_stop"() : () -> ()
    %86 = vector.extract_strided_slice %43 {offsets = [0, 0, 16], sizes = [2, 8, 8], strides = [1, 1, 1]} : vector<2x8x96xf32> to vector<2x8x8xf32>
    %87 = vector.extract_strided_slice %43 {offsets = [0, 0, 48], sizes = [2, 8, 8], strides = [1, 1, 1]} : vector<2x8x96xf32> to vector<2x8x8xf32>
    %88 = vector.extract_strided_slice %43 {offsets = [0, 0, 80], sizes = [2, 8, 8], strides = [1, 1, 1]} : vector<2x8x96xf32> to vector<2x8x8xf32>
    "tpu.trace_start"() <{level = 10 : i32, message = "bqd,bkd->bqk"}> : () -> ()
    %cst_33 = arith.constant dense<0.000000e+00> : vector<2x8x8xf32>
    %89 = tpu.matmul %86, %87, %cst_33 {dimension_numbers = #tpu.dot_dimension_numbers<[2], [2], [1], [1], [0, 0, 0, 1, 1, 1], [0], [0]>} : vector<2x8x8xf32>, vector<2x8x8xf32>, vector<2x8x8xf32> -> vector<2x8x8xf32>
    "tpu.trace_stop"() : () -> ()
    %cst_34 = arith.constant 0.353553385 : f32
    %90 = vector.broadcast %cst_34 : f32 to vector<2x8x8xf32>
    %91 = arith.mulf %89, %90 : vector<2x8x8xf32>
    %cst_35 = arith.constant -1.000000e+30 : f32
    %92 = vector.shape_cast %9 : vector<1x8x8xi1> to vector<1x8x8xi1>
    %93 = vector.broadcast %92 : vector<1x8x8xi1> to vector<2x8x8xi1>
    %94 = vector.broadcast %cst_35 : f32 to vector<2x8x8xf32>
    %95 = arith.select %93, %91, %94 : vector<2x8x8xi1>, vector<2x8x8xf32>
    %cst_36 = arith.constant dense<0xFF800000> : vector<2x8xf32>
    %96 = vector.multi_reduction <maximumf>, %95, %cst_36 [2] : vector<2x8x8xf32> to vector<2x8xf32>
    %97 = vector.shape_cast %96 : vector<2x8xf32> to vector<2x8x1xf32>
    %98 = vector.broadcast %97 : vector<2x8x1xf32> to vector<2x8x8xf32>
    %99 = arith.subf %95, %98 : vector<2x8x8xf32>
    %100 = math.exp %99 : vector<2x8x8xf32>
    %cst_37 = arith.constant dense<0.000000e+00> : vector<2x8xf32>
    %101 = vector.multi_reduction <add>, %100, %cst_37 [2] : vector<2x8x8xf32> to vector<2x8xf32>
    %102 = vector.shape_cast %101 : vector<2x8xf32> to vector<2x8x1xf32>
    %103 = tpu.reciprocal %102 {approx = true} : vector<2x8x1xf32> -> vector<2x8x1xf32>
    %104 = vector.broadcast %103 : vector<2x8x1xf32> to vector<2x8x8xf32>
    %105 = arith.mulf %100, %104 : vector<2x8x8xf32>
    "tpu.trace_start"() <{level = 10 : i32, message = "bqk,bkd->bqd"}> : () -> ()
    %cst_38 = arith.constant dense<0.000000e+00> : vector<2x8x8xf32>
    %106 = tpu.matmul %105, %88, %cst_38 {dimension_numbers = #tpu.dot_dimension_numbers<[2], [1], [1], [2], [0, 0, 0, 1, 1, 2], [0], [0]>} : vector<2x8x8xf32>, vector<2x8x8xf32>, vector<2x8x8xf32> -> vector<2x8x8xf32>
    "tpu.trace_stop"() : () -> ()
    %107 = vector.extract_strided_slice %43 {offsets = [0, 0, 24], sizes = [2, 8, 8], strides = [1, 1, 1]} : vector<2x8x96xf32> to vector<2x8x8xf32>
    %108 = vector.extract_strided_slice %43 {offsets = [0, 0, 56], sizes = [2, 8, 8], strides = [1, 1, 1]} : vector<2x8x96xf32> to vector<2x8x8xf32>
    %109 = vector.extract_strided_slice %43 {offsets = [0, 0, 88], sizes = [2, 8, 8], strides = [1, 1, 1]} : vector<2x8x96xf32> to vector<2x8x8xf32>
    "tpu.trace_start"() <{level = 10 : i32, message = "bqd,bkd->bqk"}> : () -> ()
    %cst_39 = arith.constant dense<0.000000e+00> : vector<2x8x8xf32>
    %110 = tpu.matmul %107, %108, %cst_39 {dimension_numbers = #tpu.dot_dimension_numbers<[2], [2], [1], [1], [0, 0, 0, 1, 1, 1], [0], [0]>} : vector<2x8x8xf32>, vector<2x8x8xf32>, vector<2x8x8xf32> -> vector<2x8x8xf32>
    "tpu.trace_stop"() : () -> ()
    %cst_40 = arith.constant 0.353553385 : f32
    %111 = vector.broadcast %cst_40 : f32 to vector<2x8x8xf32>
    %112 = arith.mulf %110, %111 : vector<2x8x8xf32>
    %cst_41 = arith.constant -1.000000e+30 : f32
    %113 = vector.shape_cast %9 : vector<1x8x8xi1> to vector<1x8x8xi1>
    %114 = vector.broadcast %113 : vector<1x8x8xi1> to vector<2x8x8xi1>
    %115 = vector.broadcast %cst_41 : f32 to vector<2x8x8xf32>
    %116 = arith.select %114, %112, %115 : vector<2x8x8xi1>, vector<2x8x8xf32>
    %cst_42 = arith.constant dense<0xFF800000> : vector<2x8xf32>
    %117 = vector.multi_reduction <maximumf>, %116, %cst_42 [2] : vector<2x8x8xf32> to vector<2x8xf32>
    %118 = vector.shape_cast %117 : vector<2x8xf32> to vector<2x8x1xf32>
    %119 = vector.broadcast %118 : vector<2x8x1xf32> to vector<2x8x8xf32>
    %120 = arith.subf %116, %119 : vector<2x8x8xf32>
    %121 = math.exp %120 : vector<2x8x8xf32>
    %cst_43 = arith.constant dense<0.000000e+00> : vector<2x8xf32>
    %122 = vector.multi_reduction <add>, %121, %cst_43 [2] : vector<2x8x8xf32> to vector<2x8xf32>
    %123 = vector.shape_cast %122 : vector<2x8xf32> to vector<2x8x1xf32>
    %124 = tpu.reciprocal %123 {approx = true} : vector<2x8x1xf32> -> vector<2x8x1xf32>
    %125 = vector.broadcast %124 : vector<2x8x1xf32> to vector<2x8x8xf32>
    %126 = arith.mulf %121, %125 : vector<2x8x8xf32>
    "tpu.trace_start"() <{level = 10 : i32, message = "bqk,bkd->bqd"}> : () -> ()
    %cst_44 = arith.constant dense<0.000000e+00> : vector<2x8x8xf32>
    %127 = tpu.matmul %126, %109, %cst_44 {dimension_numbers = #tpu.dot_dimension_numbers<[2], [1], [1], [2], [0, 0, 0, 1, 1, 2], [0], [0]>} : vector<2x8x8xf32>, vector<2x8x8xf32>, vector<2x8x8xf32> -> vector<2x8x8xf32>
    "tpu.trace_stop"() : () -> ()
    %128 = tpu.concatenate %64, %85, %106, %127 in 2 : vector<2x8x8xf32>, vector<2x8x8xf32>, vector<2x8x8xf32>, vector<2x8x8xf32> -> vector<2x8x32xf32>
    %129 = vector.shape_cast %128 : vector<2x8x32xf32> to vector<16x32xf32>
    %c0_45 = arith.constant 0 : index
    %c0_46 = arith.constant 0 : index
    %c0_47 = arith.constant 0 : index
    %130 = vector.load %arg7[%c0_45, %c0_46, %c0_47] : memref<2x32x32xf32, #tpu.memory_space<vmem>>, vector<1x32x32xf32>
    %131 = vector.shape_cast %130 : vector<1x32x32xf32> to vector<32x32xf32>
    %cst_48 = arith.constant dense<0.000000e+00> : vector<16x32xf32>
    %132 = tpu.matmul %129, %131, %cst_48 {dimension_numbers = #tpu.dot_dimension_numbers<[1], [0], [0], [1], [0, 0, 1, 1], [], []>} : vector<16x32xf32>, vector<32x32xf32>, vector<16x32xf32> -> vector<16x32xf32>
    %c0_49 = arith.constant 0 : index
    %c0_50 = arith.constant 0 : index
    %c0_51 = arith.constant 0 : index
    %133 = vector.load %arg8[%c0_49, %c0_50, %c0_51] : memref<2x1x32xf32, #tpu.memory_space<vmem>>, vector<1x1x32xf32>
    %134 = vector.shape_cast %133 : vector<1x1x32xf32> to vector<1x32xf32>
    %135 = vector.broadcast %134 : vector<1x32xf32> to vector<16x32xf32>
    %136 = arith.addf %132, %135 : vector<16x32xf32>
    %137 = arith.addf %5, %136 : vector<16x32xf32>
    %c0_52 = arith.constant 0 : index
    %c0_53 = arith.constant 0 : index
    %c0_54 = arith.constant 0 : index
    %138 = vector.load %arg9[%c0_52, %c0_53, %c0_54] : memref<2x1x32xf32, #tpu.memory_space<vmem>>, vector<1x1x32xf32>
    %139 = vector.shape_cast %138 : vector<1x1x32xf32> to vector<1x32xf32>
    %c0_55 = arith.constant 0 : index
    %c0_56 = arith.constant 0 : index
    %c0_57 = arith.constant 0 : index
    %140 = vector.load %arg10[%c0_55, %c0_56, %c0_57] : memref<2x1x32xf32, #tpu.memory_space<vmem>>, vector<1x1x32xf32>
    %141 = vector.shape_cast %140 : vector<1x1x32xf32> to vector<1x32xf32>
    %cst_58 = arith.constant dense<0.000000e+00> : vector<16xf32>
    %142 = vector.multi_reduction <add>, %137, %cst_58 [1] : vector<16x32xf32> to vector<16xf32>
    %143 = vector.shape_cast %142 : vector<16xf32> to vector<16x1xf32>
    %cst_59 = arith.constant 3.200000e+01 : f32
    %144 = vector.broadcast %cst_59 : f32 to vector<16x1xf32>
    %145 = arith.divf %143, %144 : vector<16x1xf32>
    %146 = vector.broadcast %145 : vector<16x1xf32> to vector<16x32xf32>
    %147 = arith.subf %137, %146 : vector<16x32xf32>
    %148 = arith.mulf %147, %147 : vector<16x32xf32>
    %cst_60 = arith.constant dense<0.000000e+00> : vector<16xf32>
    %149 = vector.multi_reduction <add>, %148, %cst_60 [1] : vector<16x32xf32> to vector<16xf32>
    %150 = vector.shape_cast %149 : vector<16xf32> to vector<16x1xf32>
    %cst_61 = arith.constant 3.200000e+01 : f32
    %151 = vector.broadcast %cst_61 : f32 to vector<16x1xf32>
    %152 = arith.divf %150, %151 : vector<16x1xf32>
    %153 = vector.broadcast %145 : vector<16x1xf32> to vector<16x32xf32>
    %154 = arith.subf %137, %153 : vector<16x32xf32>
    %cst_62 = arith.constant 9.99999974E-6 : f32
    %155 = vector.broadcast %cst_62 : f32 to vector<16x1xf32>
    %156 = arith.addf %152, %155 : vector<16x1xf32>
    %157 = math.rsqrt %156 : vector<16x1xf32>
    %158 = vector.broadcast %157 : vector<16x1xf32> to vector<16x32xf32>
    %159 = arith.mulf %154, %158 : vector<16x32xf32>
    %160 = vector.broadcast %139 : vector<1x32xf32> to vector<16x32xf32>
    %161 = arith.mulf %159, %160 : vector<16x32xf32>
    %162 = vector.broadcast %141 : vector<1x32xf32> to vector<16x32xf32>
    %163 = arith.addf %161, %162 : vector<16x32xf32>
    %c0_63 = arith.constant 0 : index
    %c0_64 = arith.constant 0 : index
    %c0_65 = arith.constant 0 : index
    %164 = vector.load %arg11[%c0_63, %c0_64, %c0_65] : memref<2x32x128xf32, #tpu.memory_space<vmem>>, vector<1x32x128xf32>
    %165 = vector.shape_cast %164 : vector<1x32x128xf32> to vector<32x128xf32>
    %cst_66 = arith.constant dense<0.000000e+00> : vector<16x128xf32>
    %166 = tpu.matmul %163, %165, %cst_66 {dimension_numbers = #tpu.dot_dimension_numbers<[1], [0], [0], [1], [0, 0, 1, 1], [], []>} : vector<16x32xf32>, vector<32x128xf32>, vector<16x128xf32> -> vector<16x128xf32>
    %c0_67 = arith.constant 0 : index
    %c0_68 = arith.constant 0 : index
    %c0_69 = arith.constant 0 : index
    %167 = vector.load %arg12[%c0_67, %c0_68, %c0_69] : memref<2x1x128xf32, #tpu.memory_space<vmem>>, vector<1x1x128xf32>
    %168 = vector.shape_cast %167 : vector<1x1x128xf32> to vector<1x128xf32>
    %169 = vector.broadcast %168 : vector<1x128xf32> to vector<16x128xf32>
    %170 = arith.addf %166, %169 : vector<16x128xf32>
    %cst_70 = arith.constant 1.702000e+00 : f32
    %171 = vector.broadcast %cst_70 : f32 to vector<16x128xf32>
    %172 = arith.mulf %171, %170 : vector<16x128xf32>
    %173 = arith.negf %172 : vector<16x128xf32>
    %174 = math.exp %173 : vector<16x128xf32>
    %cst_71 = arith.constant 1.000000e+00 : f32
    %175 = vector.broadcast %cst_71 : f32 to vector<16x128xf32>
    %176 = arith.addf %175, %174 : vector<16x128xf32>
    %177 = arith.divf %175, %176 : vector<16x128xf32>
    %178 = arith.mulf %170, %177 : vector<16x128xf32>
    %c0_72 = arith.constant 0 : index
    %c0_73 = arith.constant 0 : index
    %c0_74 = arith.constant 0 : index
    %179 = vector.load %arg13[%c0_72, %c0_73, %c0_74] : memref<2x128x32xf32, #tpu.memory_space<vmem>>, vector<1x128x32xf32>
    %180 = vector.shape_cast %179 : vector<1x128x32xf32> to vector<128x32xf32>
    %cst_75 = arith.constant dense<0.000000e+00> : vector<16x32xf32>
    %181 = tpu.matmul %178, %180, %cst_75 {dimension_numbers = #tpu.dot_dimension_numbers<[1], [0], [0], [1], [0, 0, 1, 1], [], []>} : vector<16x128xf32>, vector<128x32xf32>, vector<16x32xf32> -> vector<16x32xf32>
    %c0_76 = arith.constant 0 : index
    %c0_77 = arith.constant 0 : index
    %c0_78 = arith.constant 0 : index
    %182 = vector.load %arg14[%c0_76, %c0_77, %c0_78] : memref<2x1x32xf32, #tpu.memory_space<vmem>>, vector<1x1x32xf32>
    %183 = vector.shape_cast %182 : vector<1x1x32xf32> to vector<1x32xf32>
    %184 = vector.broadcast %183 : vector<1x32xf32> to vector<16x32xf32>
    %185 = arith.addf %181, %184 : vector<16x32xf32>
    %186 = arith.addf %137, %185 : vector<16x32xf32>
    %c1 = arith.constant 1 : index
    %c0_79 = arith.constant 0 : index
    %c0_80 = arith.constant 0 : index
    %187 = vector.load %arg3[%c1, %c0_79, %c0_80] : memref<2x1x32xf32, #tpu.memory_space<vmem>>, vector<1x1x32xf32>
    %188 = vector.shape_cast %187 : vector<1x1x32xf32> to vector<1x32xf32>
    %c1_81 = arith.constant 1 : index
    %c0_82 = arith.constant 0 : index
    %c0_83 = arith.constant 0 : index
    %189 = vector.load %arg4[%c1_81, %c0_82, %c0_83] : memref<2x1x32xf32, #tpu.memory_space<vmem>>, vector<1x1x32xf32>
    %190 = vector.shape_cast %189 : vector<1x1x32xf32> to vector<1x32xf32>
    %cst_84 = arith.constant dense<0.000000e+00> : vector<16xf32>
    %191 = vector.multi_reduction <add>, %186, %cst_84 [1] : vector<16x32xf32> to vector<16xf32>
    %192 = vector.shape_cast %191 : vector<16xf32> to vector<16x1xf32>
    %cst_85 = arith.constant 3.200000e+01 : f32
    %193 = vector.broadcast %cst_85 : f32 to vector<16x1xf32>
    %194 = arith.divf %192, %193 : vector<16x1xf32>
    %195 = vector.broadcast %194 : vector<16x1xf32> to vector<16x32xf32>
    %196 = arith.subf %186, %195 : vector<16x32xf32>
    %197 = arith.mulf %196, %196 : vector<16x32xf32>
    %cst_86 = arith.constant dense<0.000000e+00> : vector<16xf32>
    %198 = vector.multi_reduction <add>, %197, %cst_86 [1] : vector<16x32xf32> to vector<16xf32>
    %199 = vector.shape_cast %198 : vector<16xf32> to vector<16x1xf32>
    %cst_87 = arith.constant 3.200000e+01 : f32
    %200 = vector.broadcast %cst_87 : f32 to vector<16x1xf32>
    %201 = arith.divf %199, %200 : vector<16x1xf32>
    %202 = vector.broadcast %194 : vector<16x1xf32> to vector<16x32xf32>
    %203 = arith.subf %186, %202 : vector<16x32xf32>
    %cst_88 = arith.constant 9.99999974E-6 : f32
    %204 = vector.broadcast %cst_88 : f32 to vector<16x1xf32>
    %205 = arith.addf %201, %204 : vector<16x1xf32>
    %206 = math.rsqrt %205 : vector<16x1xf32>
    %207 = vector.broadcast %206 : vector<16x1xf32> to vector<16x32xf32>
    %208 = arith.mulf %203, %207 : vector<16x32xf32>
    %209 = vector.broadcast %188 : vector<1x32xf32> to vector<16x32xf32>
    %210 = arith.mulf %208, %209 : vector<16x32xf32>
    %211 = vector.broadcast %190 : vector<1x32xf32> to vector<16x32xf32>
    %212 = arith.addf %210, %211 : vector<16x32xf32>
    %c1_89 = arith.constant 1 : index
    %c0_90 = arith.constant 0 : index
    %c0_91 = arith.constant 0 : index
    %213 = vector.load %arg5[%c1_89, %c0_90, %c0_91] : memref<2x32x96xf32, #tpu.memory_space<vmem>>, vector<1x32x96xf32>
    %214 = vector.shape_cast %213 : vector<1x32x96xf32> to vector<32x96xf32>
    %cst_92 = arith.constant dense<0.000000e+00> : vector<16x96xf32>
    %215 = tpu.matmul %212, %214, %cst_92 {dimension_numbers = #tpu.dot_dimension_numbers<[1], [0], [0], [1], [0, 0, 1, 1], [], []>} : vector<16x32xf32>, vector<32x96xf32>, vector<16x96xf32> -> vector<16x96xf32>
    %c1_93 = arith.constant 1 : index
    %c0_94 = arith.constant 0 : index
    %c0_95 = arith.constant 0 : index
    %216 = vector.load %arg6[%c1_93, %c0_94, %c0_95] : memref<2x1x96xf32, #tpu.memory_space<vmem>>, vector<1x1x96xf32>
    %217 = vector.shape_cast %216 : vector<1x1x96xf32> to vector<1x96xf32>
    %218 = vector.broadcast %217 : vector<1x96xf32> to vector<16x96xf32>
    %219 = arith.addf %215, %218 : vector<16x96xf32>
    %220 = vector.shape_cast %219 : vector<16x96xf32> to vector<2x8x96xf32>
    %221 = vector.extract_strided_slice %220 {offsets = [0, 0, 0], sizes = [2, 8, 8], strides = [1, 1, 1]} : vector<2x8x96xf32> to vector<2x8x8xf32>
    %222 = vector.extract_strided_slice %220 {offsets = [0, 0, 32], sizes = [2, 8, 8], strides = [1, 1, 1]} : vector<2x8x96xf32> to vector<2x8x8xf32>
    %223 = vector.extract_strided_slice %220 {offsets = [0, 0, 64], sizes = [2, 8, 8], strides = [1, 1, 1]} : vector<2x8x96xf32> to vector<2x8x8xf32>
    "tpu.trace_start"() <{level = 10 : i32, message = "bqd,bkd->bqk"}> : () -> ()
    %cst_96 = arith.constant dense<0.000000e+00> : vector<2x8x8xf32>
    %224 = tpu.matmul %221, %222, %cst_96 {dimension_numbers = #tpu.dot_dimension_numbers<[2], [2], [1], [1], [0, 0, 0, 1, 1, 1], [0], [0]>} : vector<2x8x8xf32>, vector<2x8x8xf32>, vector<2x8x8xf32> -> vector<2x8x8xf32>
    "tpu.trace_stop"() : () -> ()
    %cst_97 = arith.constant 0.353553385 : f32
    %225 = vector.broadcast %cst_97 : f32 to vector<2x8x8xf32>
    %226 = arith.mulf %224, %225 : vector<2x8x8xf32>
    %cst_98 = arith.constant -1.000000e+30 : f32
    %227 = vector.shape_cast %9 : vector<1x8x8xi1> to vector<1x8x8xi1>
    %228 = vector.broadcast %227 : vector<1x8x8xi1> to vector<2x8x8xi1>
    %229 = vector.broadcast %cst_98 : f32 to vector<2x8x8xf32>
    %230 = arith.select %228, %226, %229 : vector<2x8x8xi1>, vector<2x8x8xf32>
    %cst_99 = arith.constant dense<0xFF800000> : vector<2x8xf32>
    %231 = vector.multi_reduction <maximumf>, %230, %cst_99 [2] : vector<2x8x8xf32> to vector<2x8xf32>
    %232 = vector.shape_cast %231 : vector<2x8xf32> to vector<2x8x1xf32>
    %233 = vector.broadcast %232 : vector<2x8x1xf32> to vector<2x8x8xf32>
    %234 = arith.subf %230, %233 : vector<2x8x8xf32>
    %235 = math.exp %234 : vector<2x8x8xf32>
    %cst_100 = arith.constant dense<0.000000e+00> : vector<2x8xf32>
    %236 = vector.multi_reduction <add>, %235, %cst_100 [2] : vector<2x8x8xf32> to vector<2x8xf32>
    %237 = vector.shape_cast %236 : vector<2x8xf32> to vector<2x8x1xf32>
    %238 = tpu.reciprocal %237 {approx = true} : vector<2x8x1xf32> -> vector<2x8x1xf32>
    %239 = vector.broadcast %238 : vector<2x8x1xf32> to vector<2x8x8xf32>
    %240 = arith.mulf %235, %239 : vector<2x8x8xf32>
    "tpu.trace_start"() <{level = 10 : i32, message = "bqk,bkd->bqd"}> : () -> ()
    %cst_101 = arith.constant dense<0.000000e+00> : vector<2x8x8xf32>
    %241 = tpu.matmul %240, %223, %cst_101 {dimension_numbers = #tpu.dot_dimension_numbers<[2], [1], [1], [2], [0, 0, 0, 1, 1, 2], [0], [0]>} : vector<2x8x8xf32>, vector<2x8x8xf32>, vector<2x8x8xf32> -> vector<2x8x8xf32>
    "tpu.trace_stop"() : () -> ()
    %242 = vector.extract_strided_slice %220 {offsets = [0, 0, 8], sizes = [2, 8, 8], strides = [1, 1, 1]} : vector<2x8x96xf32> to vector<2x8x8xf32>
    %243 = vector.extract_strided_slice %220 {offsets = [0, 0, 40], sizes = [2, 8, 8], strides = [1, 1, 1]} : vector<2x8x96xf32> to vector<2x8x8xf32>
    %244 = vector.extract_strided_slice %220 {offsets = [0, 0, 72], sizes = [2, 8, 8], strides = [1, 1, 1]} : vector<2x8x96xf32> to vector<2x8x8xf32>
    "tpu.trace_start"() <{level = 10 : i32, message = "bqd,bkd->bqk"}> : () -> ()
    %cst_102 = arith.constant dense<0.000000e+00> : vector<2x8x8xf32>
    %245 = tpu.matmul %242, %243, %cst_102 {dimension_numbers = #tpu.dot_dimension_numbers<[2], [2], [1], [1], [0, 0, 0, 1, 1, 1], [0], [0]>} : vector<2x8x8xf32>, vector<2x8x8xf32>, vector<2x8x8xf32> -> vector<2x8x8xf32>
    "tpu.trace_stop"() : () -> ()
    %cst_103 = arith.constant 0.353553385 : f32
    %246 = vector.broadcast %cst_103 : f32 to vector<2x8x8xf32>
    %247 = arith.mulf %245, %246 : vector<2x8x8xf32>
    %cst_104 = arith.constant -1.000000e+30 : f32
    %248 = vector.shape_cast %9 : vector<1x8x8xi1> to vector<1x8x8xi1>
    %249 = vector.broadcast %248 : vector<1x8x8xi1> to vector<2x8x8xi1>
    %250 = vector.broadcast %cst_104 : f32 to vector<2x8x8xf32>
    %251 = arith.select %249, %247, %250 : vector<2x8x8xi1>, vector<2x8x8xf32>
    %cst_105 = arith.constant dense<0xFF800000> : vector<2x8xf32>
    %252 = vector.multi_reduction <maximumf>, %251, %cst_105 [2] : vector<2x8x8xf32> to vector<2x8xf32>
    %253 = vector.shape_cast %252 : vector<2x8xf32> to vector<2x8x1xf32>
    %254 = vector.broadcast %253 : vector<2x8x1xf32> to vector<2x8x8xf32>
    %255 = arith.subf %251, %254 : vector<2x8x8xf32>
    %256 = math.exp %255 : vector<2x8x8xf32>
    %cst_106 = arith.constant dense<0.000000e+00> : vector<2x8xf32>
    %257 = vector.multi_reduction <add>, %256, %cst_106 [2] : vector<2x8x8xf32> to vector<2x8xf32>
    %258 = vector.shape_cast %257 : vector<2x8xf32> to vector<2x8x1xf32>
    %259 = tpu.reciprocal %258 {approx = true} : vector<2x8x1xf32> -> vector<2x8x1xf32>
    %260 = vector.broadcast %259 : vector<2x8x1xf32> to vector<2x8x8xf32>
    %261 = arith.mulf %256, %260 : vector<2x8x8xf32>
    "tpu.trace_start"() <{level = 10 : i32, message = "bqk,bkd->bqd"}> : () -> ()
    %cst_107 = arith.constant dense<0.000000e+00> : vector<2x8x8xf32>
    %262 = tpu.matmul %261, %244, %cst_107 {dimension_numbers = #tpu.dot_dimension_numbers<[2], [1], [1], [2], [0, 0, 0, 1, 1, 2], [0], [0]>} : vector<2x8x8xf32>, vector<2x8x8xf32>, vector<2x8x8xf32> -> vector<2x8x8xf32>
    "tpu.trace_stop"() : () -> ()
    %263 = vector.extract_strided_slice %220 {offsets = [0, 0, 16], sizes = [2, 8, 8], strides = [1, 1, 1]} : vector<2x8x96xf32> to vector<2x8x8xf32>
    %264 = vector.extract_strided_slice %220 {offsets = [0, 0, 48], sizes = [2, 8, 8], strides = [1, 1, 1]} : vector<2x8x96xf32> to vector<2x8x8xf32>
    %265 = vector.extract_strided_slice %220 {offsets = [0, 0, 80], sizes = [2, 8, 8], strides = [1, 1, 1]} : vector<2x8x96xf32> to vector<2x8x8xf32>
    "tpu.trace_start"() <{level = 10 : i32, message = "bqd,bkd->bqk"}> : () -> ()
    %cst_108 = arith.constant dense<0.000000e+00> : vector<2x8x8xf32>
    %266 = tpu.matmul %263, %264, %cst_108 {dimension_numbers = #tpu.dot_dimension_numbers<[2], [2], [1], [1], [0, 0, 0, 1, 1, 1], [0], [0]>} : vector<2x8x8xf32>, vector<2x8x8xf32>, vector<2x8x8xf32> -> vector<2x8x8xf32>
    "tpu.trace_stop"() : () -> ()
    %cst_109 = arith.constant 0.353553385 : f32
    %267 = vector.broadcast %cst_109 : f32 to vector<2x8x8xf32>
    %268 = arith.mulf %266, %267 : vector<2x8x8xf32>
    %cst_110 = arith.constant -1.000000e+30 : f32
    %269 = vector.shape_cast %9 : vector<1x8x8xi1> to vector<1x8x8xi1>
    %270 = vector.broadcast %269 : vector<1x8x8xi1> to vector<2x8x8xi1>
    %271 = vector.broadcast %cst_110 : f32 to vector<2x8x8xf32>
    %272 = arith.select %270, %268, %271 : vector<2x8x8xi1>, vector<2x8x8xf32>
    %cst_111 = arith.constant dense<0xFF800000> : vector<2x8xf32>
    %273 = vector.multi_reduction <maximumf>, %272, %cst_111 [2] : vector<2x8x8xf32> to vector<2x8xf32>
    %274 = vector.shape_cast %273 : vector<2x8xf32> to vector<2x8x1xf32>
    %275 = vector.broadcast %274 : vector<2x8x1xf32> to vector<2x8x8xf32>
    %276 = arith.subf %272, %275 : vector<2x8x8xf32>
    %277 = math.exp %276 : vector<2x8x8xf32>
    %cst_112 = arith.constant dense<0.000000e+00> : vector<2x8xf32>
    %278 = vector.multi_reduction <add>, %277, %cst_112 [2] : vector<2x8x8xf32> to vector<2x8xf32>
    %279 = vector.shape_cast %278 : vector<2x8xf32> to vector<2x8x1xf32>
    %280 = tpu.reciprocal %279 {approx = true} : vector<2x8x1xf32> -> vector<2x8x1xf32>
    %281 = vector.broadcast %280 : vector<2x8x1xf32> to vector<2x8x8xf32>
    %282 = arith.mulf %277, %281 : vector<2x8x8xf32>
    "tpu.trace_start"() <{level = 10 : i32, message = "bqk,bkd->bqd"}> : () -> ()
    %cst_113 = arith.constant dense<0.000000e+00> : vector<2x8x8xf32>
    %283 = tpu.matmul %282, %265, %cst_113 {dimension_numbers = #tpu.dot_dimension_numbers<[2], [1], [1], [2], [0, 0, 0, 1, 1, 2], [0], [0]>} : vector<2x8x8xf32>, vector<2x8x8xf32>, vector<2x8x8xf32> -> vector<2x8x8xf32>
    "tpu.trace_stop"() : () -> ()
    %284 = vector.extract_strided_slice %220 {offsets = [0, 0, 24], sizes = [2, 8, 8], strides = [1, 1, 1]} : vector<2x8x96xf32> to vector<2x8x8xf32>
    %285 = vector.extract_strided_slice %220 {offsets = [0, 0, 56], sizes = [2, 8, 8], strides = [1, 1, 1]} : vector<2x8x96xf32> to vector<2x8x8xf32>
    %286 = vector.extract_strided_slice %220 {offsets = [0, 0, 88], sizes = [2, 8, 8], strides = [1, 1, 1]} : vector<2x8x96xf32> to vector<2x8x8xf32>
    "tpu.trace_start"() <{level = 10 : i32, message = "bqd,bkd->bqk"}> : () -> ()
    %cst_114 = arith.constant dense<0.000000e+00> : vector<2x8x8xf32>
    %287 = tpu.matmul %284, %285, %cst_114 {dimension_numbers = #tpu.dot_dimension_numbers<[2], [2], [1], [1], [0, 0, 0, 1, 1, 1], [0], [0]>} : vector<2x8x8xf32>, vector<2x8x8xf32>, vector<2x8x8xf32> -> vector<2x8x8xf32>
    "tpu.trace_stop"() : () -> ()
    %cst_115 = arith.constant 0.353553385 : f32
    %288 = vector.broadcast %cst_115 : f32 to vector<2x8x8xf32>
    %289 = arith.mulf %287, %288 : vector<2x8x8xf32>
    %cst_116 = arith.constant -1.000000e+30 : f32
    %290 = vector.shape_cast %9 : vector<1x8x8xi1> to vector<1x8x8xi1>
    %291 = vector.broadcast %290 : vector<1x8x8xi1> to vector<2x8x8xi1>
    %292 = vector.broadcast %cst_116 : f32 to vector<2x8x8xf32>
    %293 = arith.select %291, %289, %292 : vector<2x8x8xi1>, vector<2x8x8xf32>
    %cst_117 = arith.constant dense<0xFF800000> : vector<2x8xf32>
    %294 = vector.multi_reduction <maximumf>, %293, %cst_117 [2] : vector<2x8x8xf32> to vector<2x8xf32>
    %295 = vector.shape_cast %294 : vector<2x8xf32> to vector<2x8x1xf32>
    %296 = vector.broadcast %295 : vector<2x8x1xf32> to vector<2x8x8xf32>
    %297 = arith.subf %293, %296 : vector<2x8x8xf32>
    %298 = math.exp %297 : vector<2x8x8xf32>
    %cst_118 = arith.constant dense<0.000000e+00> : vector<2x8xf32>
    %299 = vector.multi_reduction <add>, %298, %cst_118 [2] : vector<2x8x8xf32> to vector<2x8xf32>
    %300 = vector.shape_cast %299 : vector<2x8xf32> to vector<2x8x1xf32>
    %301 = tpu.reciprocal %300 {approx = true} : vector<2x8x1xf32> -> vector<2x8x1xf32>
    %302 = vector.broadcast %301 : vector<2x8x1xf32> to vector<2x8x8xf32>
    %303 = arith.mulf %298, %302 : vector<2x8x8xf32>
    "tpu.trace_start"() <{level = 10 : i32, message = "bqk,bkd->bqd"}> : () -> ()
    %cst_119 = arith.constant dense<0.000000e+00> : vector<2x8x8xf32>
    %304 = tpu.matmul %303, %286, %cst_119 {dimension_numbers = #tpu.dot_dimension_numbers<[2], [1], [1], [2], [0, 0, 0, 1, 1, 2], [0], [0]>} : vector<2x8x8xf32>, vector<2x8x8xf32>, vector<2x8x8xf32> -> vector<2x8x8xf32>
    "tpu.trace_stop"() : () -> ()
    %305 = tpu.concatenate %241, %262, %283, %304 in 2 : vector<2x8x8xf32>, vector<2x8x8xf32>, vector<2x8x8xf32>, vector<2x8x8xf32> -> vector<2x8x32xf32>
    %306 = vector.shape_cast %305 : vector<2x8x32xf32> to vector<16x32xf32>
    %c1_120 = arith.constant 1 : index
    %c0_121 = arith.constant 0 : index
    %c0_122 = arith.constant 0 : index
    %307 = vector.load %arg7[%c1_120, %c0_121, %c0_122] : memref<2x32x32xf32, #tpu.memory_space<vmem>>, vector<1x32x32xf32>
    %308 = vector.shape_cast %307 : vector<1x32x32xf32> to vector<32x32xf32>
    %cst_123 = arith.constant dense<0.000000e+00> : vector<16x32xf32>
    %309 = tpu.matmul %306, %308, %cst_123 {dimension_numbers = #tpu.dot_dimension_numbers<[1], [0], [0], [1], [0, 0, 1, 1], [], []>} : vector<16x32xf32>, vector<32x32xf32>, vector<16x32xf32> -> vector<16x32xf32>
    %c1_124 = arith.constant 1 : index
    %c0_125 = arith.constant 0 : index
    %c0_126 = arith.constant 0 : index
    %310 = vector.load %arg8[%c1_124, %c0_125, %c0_126] : memref<2x1x32xf32, #tpu.memory_space<vmem>>, vector<1x1x32xf32>
    %311 = vector.shape_cast %310 : vector<1x1x32xf32> to vector<1x32xf32>
    %312 = vector.broadcast %311 : vector<1x32xf32> to vector<16x32xf32>
    %313 = arith.addf %309, %312 : vector<16x32xf32>
    %314 = arith.addf %186, %313 : vector<16x32xf32>
    %c1_127 = arith.constant 1 : index
    %c0_128 = arith.constant 0 : index
    %c0_129 = arith.constant 0 : index
    %315 = vector.load %arg9[%c1_127, %c0_128, %c0_129] : memref<2x1x32xf32, #tpu.memory_space<vmem>>, vector<1x1x32xf32>
    %316 = vector.shape_cast %315 : vector<1x1x32xf32> to vector<1x32xf32>
    %c1_130 = arith.constant 1 : index
    %c0_131 = arith.constant 0 : index
    %c0_132 = arith.constant 0 : index
    %317 = vector.load %arg10[%c1_130, %c0_131, %c0_132] : memref<2x1x32xf32, #tpu.memory_space<vmem>>, vector<1x1x32xf32>
    %318 = vector.shape_cast %317 : vector<1x1x32xf32> to vector<1x32xf32>
    %cst_133 = arith.constant dense<0.000000e+00> : vector<16xf32>
    %319 = vector.multi_reduction <add>, %314, %cst_133 [1] : vector<16x32xf32> to vector<16xf32>
    %320 = vector.shape_cast %319 : vector<16xf32> to vector<16x1xf32>
    %cst_134 = arith.constant 3.200000e+01 : f32
    %321 = vector.broadcast %cst_134 : f32 to vector<16x1xf32>
    %322 = arith.divf %320, %321 : vector<16x1xf32>
    %323 = vector.broadcast %322 : vector<16x1xf32> to vector<16x32xf32>
    %324 = arith.subf %314, %323 : vector<16x32xf32>
    %325 = arith.mulf %324, %324 : vector<16x32xf32>
    %cst_135 = arith.constant dense<0.000000e+00> : vector<16xf32>
    %326 = vector.multi_reduction <add>, %325, %cst_135 [1] : vector<16x32xf32> to vector<16xf32>
    %327 = vector.shape_cast %326 : vector<16xf32> to vector<16x1xf32>
    %cst_136 = arith.constant 3.200000e+01 : f32
    %328 = vector.broadcast %cst_136 : f32 to vector<16x1xf32>
    %329 = arith.divf %327, %328 : vector<16x1xf32>
    %330 = vector.broadcast %322 : vector<16x1xf32> to vector<16x32xf32>
    %331 = arith.subf %314, %330 : vector<16x32xf32>
    %cst_137 = arith.constant 9.99999974E-6 : f32
    %332 = vector.broadcast %cst_137 : f32 to vector<16x1xf32>
    %333 = arith.addf %329, %332 : vector<16x1xf32>
    %334 = math.rsqrt %333 : vector<16x1xf32>
    %335 = vector.broadcast %334 : vector<16x1xf32> to vector<16x32xf32>
    %336 = arith.mulf %331, %335 : vector<16x32xf32>
    %337 = vector.broadcast %316 : vector<1x32xf32> to vector<16x32xf32>
    %338 = arith.mulf %336, %337 : vector<16x32xf32>
    %339 = vector.broadcast %318 : vector<1x32xf32> to vector<16x32xf32>
    %340 = arith.addf %338, %339 : vector<16x32xf32>
    %c1_138 = arith.constant 1 : index
    %c0_139 = arith.constant 0 : index
    %c0_140 = arith.constant 0 : index
    %341 = vector.load %arg11[%c1_138, %c0_139, %c0_140] : memref<2x32x128xf32, #tpu.memory_space<vmem>>, vector<1x32x128xf32>
    %342 = vector.shape_cast %341 : vector<1x32x128xf32> to vector<32x128xf32>
    %cst_141 = arith.constant dense<0.000000e+00> : vector<16x128xf32>
    %343 = tpu.matmul %340, %342, %cst_141 {dimension_numbers = #tpu.dot_dimension_numbers<[1], [0], [0], [1], [0, 0, 1, 1], [], []>} : vector<16x32xf32>, vector<32x128xf32>, vector<16x128xf32> -> vector<16x128xf32>
    %c1_142 = arith.constant 1 : index
    %c0_143 = arith.constant 0 : index
    %c0_144 = arith.constant 0 : index
    %344 = vector.load %arg12[%c1_142, %c0_143, %c0_144] : memref<2x1x128xf32, #tpu.memory_space<vmem>>, vector<1x1x128xf32>
    %345 = vector.shape_cast %344 : vector<1x1x128xf32> to vector<1x128xf32>
    %346 = vector.broadcast %345 : vector<1x128xf32> to vector<16x128xf32>
    %347 = arith.addf %343, %346 : vector<16x128xf32>
    %cst_145 = arith.constant 1.702000e+00 : f32
    %348 = vector.broadcast %cst_145 : f32 to vector<16x128xf32>
    %349 = arith.mulf %348, %347 : vector<16x128xf32>
    %350 = arith.negf %349 : vector<16x128xf32>
    %351 = math.exp %350 : vector<16x128xf32>
    %cst_146 = arith.constant 1.000000e+00 : f32
    %352 = vector.broadcast %cst_146 : f32 to vector<16x128xf32>
    %353 = arith.addf %352, %351 : vector<16x128xf32>
    %354 = arith.divf %352, %353 : vector<16x128xf32>
    %355 = arith.mulf %347, %354 : vector<16x128xf32>
    %c1_147 = arith.constant 1 : index
    %c0_148 = arith.constant 0 : index
    %c0_149 = arith.constant 0 : index
    %356 = vector.load %arg13[%c1_147, %c0_148, %c0_149] : memref<2x128x32xf32, #tpu.memory_space<vmem>>, vector<1x128x32xf32>
    %357 = vector.shape_cast %356 : vector<1x128x32xf32> to vector<128x32xf32>
    %cst_150 = arith.constant dense<0.000000e+00> : vector<16x32xf32>
    %358 = tpu.matmul %355, %357, %cst_150 {dimension_numbers = #tpu.dot_dimension_numbers<[1], [0], [0], [1], [0, 0, 1, 1], [], []>} : vector<16x128xf32>, vector<128x32xf32>, vector<16x32xf32> -> vector<16x32xf32>
    %c1_151 = arith.constant 1 : index
    %c0_152 = arith.constant 0 : index
    %c0_153 = arith.constant 0 : index
    %359 = vector.load %arg14[%c1_151, %c0_152, %c0_153] : memref<2x1x32xf32, #tpu.memory_space<vmem>>, vector<1x1x32xf32>
    %360 = vector.shape_cast %359 : vector<1x1x32xf32> to vector<1x32xf32>
    %361 = vector.broadcast %360 : vector<1x32xf32> to vector<16x32xf32>
    %362 = arith.addf %358, %361 : vector<16x32xf32>
    %363 = arith.addf %314, %362 : vector<16x32xf32>
    %c0_154 = arith.constant 0 : index
    %c0_155 = arith.constant 0 : index
    %364 = vector.load %arg15[%c0_154, %c0_155] : memref<1x32xf32, #tpu.memory_space<vmem>>, vector<1x32xf32>
    %c0_156 = arith.constant 0 : index
    %c0_157 = arith.constant 0 : index
    %365 = vector.load %arg16[%c0_156, %c0_157] : memref<1x32xf32, #tpu.memory_space<vmem>>, vector<1x32xf32>
    %cst_158 = arith.constant dense<0.000000e+00> : vector<16xf32>
    %366 = vector.multi_reduction <add>, %363, %cst_158 [1] : vector<16x32xf32> to vector<16xf32>
    %367 = vector.shape_cast %366 : vector<16xf32> to vector<16x1xf32>
    %cst_159 = arith.constant 3.200000e+01 : f32
    %368 = vector.broadcast %cst_159 : f32 to vector<16x1xf32>
    %369 = arith.divf %367, %368 : vector<16x1xf32>
    %370 = vector.broadcast %369 : vector<16x1xf32> to vector<16x32xf32>
    %371 = arith.subf %363, %370 : vector<16x32xf32>
    %372 = arith.mulf %371, %371 : vector<16x32xf32>
    %cst_160 = arith.constant dense<0.000000e+00> : vector<16xf32>
    %373 = vector.multi_reduction <add>, %372, %cst_160 [1] : vector<16x32xf32> to vector<16xf32>
    %374 = vector.shape_cast %373 : vector<16xf32> to vector<16x1xf32>
    %cst_161 = arith.constant 3.200000e+01 : f32
    %375 = vector.broadcast %cst_161 : f32 to vector<16x1xf32>
    %376 = arith.divf %374, %375 : vector<16x1xf32>
    %377 = vector.broadcast %369 : vector<16x1xf32> to vector<16x32xf32>
    %378 = arith.subf %363, %377 : vector<16x32xf32>
    %cst_162 = arith.constant 9.99999974E-6 : f32
    %379 = vector.broadcast %cst_162 : f32 to vector<16x1xf32>
    %380 = arith.addf %376, %379 : vector<16x1xf32>
    %381 = math.rsqrt %380 : vector<16x1xf32>
    %382 = vector.broadcast %381 : vector<16x1xf32> to vector<16x32xf32>
    %383 = arith.mulf %378, %382 : vector<16x32xf32>
    %384 = vector.broadcast %364 : vector<1x32xf32> to vector<16x32xf32>
    %385 = arith.mulf %383, %384 : vector<16x32xf32>
    %386 = vector.broadcast %365 : vector<1x32xf32> to vector<16x32xf32>
    %387 = arith.addf %385, %386 : vector<16x32xf32>
    %388 = tpu.iota {dimensions = array<i32: 0>} : vector<8x1xi32>
    %c0_163 = arith.constant 0 : index
    %389 = memref.load %arg0[%c0_163] : memref<2xi32, #tpu.memory_space<smem>>
    %390 = vector.extract_strided_slice %387 {offsets = [0, 0], sizes = [8, 32], strides = [1, 1]} : vector<16x32xf32> to vector<8x32xf32>
    %391 = vector.broadcast %389 : i32 to vector<8x1xi32>
    %392 = arith.cmpi eq, %388, %391 : vector<8x1xi32>
    %cst_164 = arith.constant 0.000000e+00 : f32
    %393 = vector.shape_cast %392 : vector<8x1xi1> to vector<8x1xi1>
    %394 = vector.broadcast %393 : vector<8x1xi1> to vector<8x32xi1>
    %395 = vector.broadcast %cst_164 : f32 to vector<8x32xf32>
    %396 = arith.select %394, %390, %395 : vector<8x32xi1>, vector<8x32xf32>
    %cst_165 = arith.constant dense<0.000000e+00> : vector<32xf32>
    %397 = vector.multi_reduction <add>, %396, %cst_165 [0] : vector<8x32xf32> to vector<32xf32>
    %398 = vector.shape_cast %397 : vector<32xf32> to vector<1x32xf32>
    %c1_166 = arith.constant 1 : index
    %399 = memref.load %arg0[%c1_166] : memref<2xi32, #tpu.memory_space<smem>>
    %400 = vector.extract_strided_slice %387 {offsets = [8, 0], sizes = [8, 32], strides = [1, 1]} : vector<16x32xf32> to vector<8x32xf32>
    %401 = vector.broadcast %399 : i32 to vector<8x1xi32>
    %402 = arith.cmpi eq, %388, %401 : vector<8x1xi32>
    %cst_167 = arith.constant 0.000000e+00 : f32
    %403 = vector.shape_cast %402 : vector<8x1xi1> to vector<8x1xi1>
    %404 = vector.broadcast %403 : vector<8x1xi1> to vector<8x32xi1>
    %405 = vector.broadcast %cst_167 : f32 to vector<8x32xf32>
    %406 = arith.select %404, %400, %405 : vector<8x32xi1>, vector<8x32xf32>
    %cst_168 = arith.constant dense<0.000000e+00> : vector<32xf32>
    %407 = vector.multi_reduction <add>, %406, %cst_168 [0] : vector<8x32xf32> to vector<32xf32>
    %408 = vector.shape_cast %407 : vector<32xf32> to vector<1x32xf32>
    %409 = tpu.concatenate %398, %408 in 0 : vector<1x32xf32>, vector<1x32xf32> -> vector<2x32xf32>
    %c0_169 = arith.constant 0 : index
    %c0_170 = arith.constant 0 : index
    %410 = vector.load %arg17[%c0_169, %c0_170] : memref<32x16xf32, #tpu.memory_space<vmem>>, vector<32x16xf32>
    %cst_171 = arith.constant dense<0.000000e+00> : vector<2x16xf32>
    %411 = tpu.matmul %409, %410, %cst_171 {dimension_numbers = #tpu.dot_dimension_numbers<[1], [0], [0], [1], [0, 0, 1, 1], [], []>} : vector<2x32xf32>, vector<32x16xf32>, vector<2x16xf32> -> vector<2x16xf32>
    %c0_172 = arith.constant 0 : index
    %c0_173 = arith.constant 0 : index
    %412 = vector.load %arg18[%c0_172, %c0_173] : memref<2x16xf32, #tpu.memory_space<vmem>>, vector<2x16xf32>
    tpu.vector_store %arg18[%c0_172, %c0_173], %411 {strides = array<i32>} : memref<2x16xf32, #tpu.memory_space<vmem>>, vector<2x16xf32>,
    return
  }
}

</mosaic_0001>

<bundles_post_ra>
// kernel: tpu_custom_call.1
= control target key start
LH: loop header
LB: loop body
LE: loop exit
PB: predicated region body
PF: predicated region fallthrough
CT: control target
= control target key end

     0   :  { %s3003_s0 = inlined_call_operand.vmem [shape: s32[2], index: 0, kind: input, shape index: {}]   ;;  %s3004_s1 = inlined_call_operand.vmem [shape: f32[2,8,32], index: 1, kind: input, shape index: {}]   ;;  %s3005_s2 = inlined_call_operand.vmem [shape: f32[8,32], index: 2, kind: input, shape index: {}]   ;;  %s3006_s3 = inlined_call_operand.vmem [shape: f32[2,1,32], index: 3, kind: input, shape index: {}]   ;;  %s3007_s4 = inlined_call_operand.vmem [shape: f32[2,1,32], index: 4, kind: input, shape index: {}]   ;;  %s3008_s5 = inlined_call_operand.vmem [shape: f32[2,32,96], index: 5, kind: input, shape index: {}]   ;;  %s3009_s6 = inlined_call_operand.vmem [shape: f32[2,1,96], index: 6, kind: input, shape index: {}]   ;;  %s3010_s7 = inlined_call_operand.vmem [shape: f32[2,32,32], index: 7, kind: input, shape index: {}]   ;;  %s3011_s8 = inlined_call_operand.vmem [shape: f32[2,1,32], index: 8, kind: input, shape index: {}]   ;;  %s3012_s9 = inlined_call_operand.vmem [shape: f32[2,1,32], index: 9, kind: input, shape index: {}]   ;;  %s3013_s10 = inlined_call_operand.vmem [shape: f32[2,1,32], index: 10, kind: input, shape index: {}]   ;;  %s3014_s11 = inlined_call_operand.vmem [shape: f32[2,32,128], index: 11, kind: input, shape index: {}]   ;;  %s3015_s12 = inlined_call_operand.vmem [shape: f32[2,1,128], index: 12, kind: input, shape index: {}]   ;;  %s3016_s13 = inlined_call_operand.vmem [shape: f32[2,128,32], index: 13, kind: input, shape index: {}]   ;;  %s3017_s14 = inlined_call_operand.vmem [shape: f32[2,1,32], index: 14, kind: input, shape index: {}]   ;;  %s3018_s15 = inlined_call_operand.vmem [shape: f32[1,32], index: 15, kind: input, shape index: {}]   ;;  %s3019_s16 = inlined_call_operand.vmem [shape: f32[1,32], index: 16, kind: input, shape index: {}]   ;;  %s3020_s17 = inlined_call_operand.vmem [shape: f32[32,16], index: 17, kind: input, shape index: {}]   ;;  %s3021_s18 = inlined_call_operand.hbm [shape: f32[2,16], index: 18, kind: output, shape index: {}]  }
   0x1   :  { %3039 = sst [smem:[#allocation8_spill]] %s3003_s0 }
   0x2   :  { %3040 = sst [smem:[#allocation9_spill]] %s3004_s1 }
   0x3   :  { %3041 = sst [smem:[#allocation10_spill]] %s3005_s2 }
   0x4   :  { %23 = vsyncpa [#allocation4], 0 }
   0x5   :  { %24 = vsyncpa [#allocation3], 0  ;;  %s3042_s29 = sld [smem:[#allocation8_spill]]  ;;  %s2289_s0 = smov [#allocation2]  }
   0xb   :  { %s30_s30 = sshll.u32 %s3042_s29, 4  ;;  %s31_s30 = int_to_ptr.vmem [resolvable:$true] %s30_s30 }
   0xc   :  { %33 = dma.vmem_to_smem %s31_s30, 16, %s2289_s0, [#allocation4]  }
   0xd   :  { %2285 = dma.done.wait [#allocation4], 16  }
   0xe   :  { %2286 = vsyncadd [#allocation4], 4294967280 }
   0xf   :  { %72 = sfence }
  0x10   :  { %s3043_s20 = sld [smem:[#allocation9_spill]]  ;;  %vm85_vm0 = vcmask 261120   ;;  %v2290_v7 = vmov 32.0   ;;  %v150_v24 = vld [vmem:[%s3008_s5 + $0x18] sm:$0xff]  ;;  %v149_v25 = vld [vmem:[%s3008_s5 + $0x10] sm:$0xff]  ;;  %v148_v26 = vld [vmem:[%s3008_s5 + $0x8] sm:$0xff] }
  0x11   :  { %s3044_s2 = sld [smem:[#allocation10_spill]]  ;;  %2147 = vrcp.f32 %v2290_v7  ;;  %173 = vmatpush.msra.mxu0 %v150_v24  ;;  %v147_v27 = vld [vmem:[%s3008_s5] sm:$0xff]  ;;  %s2291_s24 = smov 120   ;;  %vm187_vm8 = vcmask 64512   ;;  %vm747_vm10 = vcmask 130048   ;;  %vm750_vm11 = vcmask 195584  }
  0x12   :  { %v2129_v42 = vld [vmem:[%s3006_s3] ss:$0 sm:$0xff]  ;;  %s2292_s25 = smov 96   ;;  %s3031_s26 = smov 112  }
  0x13   :  { %174 = vmatpush.msra.mxu0 %v149_v25  ;;  %v2130_v46 = vld [vmem:[%s3007_s4] ss:$0 sm:$0xff]  ;;  %s2294_s27 = smov 88   ;;  %s3027_s28 = smov 72  }
  0x14   :  { %v2131_v57 = vld [vmem:[%s3009_s6] ss:$0 sm:$0xff]  ;;  %s2296_s29 = smov 56   ;;  %s3029_s30 = smov 80  }
  0x15   :  { %175 = vmatpush.msra.mxu0 %v148_v26  ;;  %s3025_s0 = smov 104   ;;  %s2299_s19 = smov 64  }
  0x16   :  { %v73_v0 = vld [vmem:[%s3043_s20] sm:$0xff]  ;;  %v74_v2 = vld [vmem:[%s3043_s20 + $0x8] sm:$0xff]  ;;  %s3023_s1 = smov 40   ;;  %s3024_s20 = smov 48  }
  0x17   :  { %v75_v1 = vld [vmem:[%s3044_s2] sm:$0xff]  ;;  %v2148_v8 = vpop.eup %2147  ;;  %176 = vmatpush.msra.mxu0 %v147_v27  ;;  %s3033_s21 = smov 8   ;;  %s3037_s22 = smov 16  }
  0x18   :  { %v2413_v3 = vadd.f32 %v75_v1, %v73_v0  ;;  %v2417_v5 = vadd.f32 %v75_v1, %v74_v2  ;;  %v93_v9 = vmul.f32 32.0, %v2148_v8  ;;  %vm97_vm1 = vweird.f32 %v2148_v8  ;;  %s3035_s2 = smov 24  }
  0x1a   :  { %v86_v4 = vsel %vm85_vm0, %v2413_v3, 0.0  ;;  %v89_v6 = vsel %vm85_vm0, %v2417_v5, 0.0  ;;  %v94_v10 = vsub.f32 1.0, %v93_v9 }
  0x1b   :  { %87 = vadd.xlane.f32.xlu0 %v86_v4 }
  0x1c   :  { %v95_v11 = vmul.f32 %v2148_v8, %v94_v10 }
  0x1e   :  { %v96_v12 = vadd.f32 %v2148_v8, %v95_v11 }
  0x20   :  { %v2421_v13 = vsel %vm97_vm1, %v2148_v8, %v96_v12 }
  0x23   :  { %90 = vadd.xlane.f32.xlu0 %v89_v6  ;;  %v78_v6 = vlaneseq }
  0x25   :  { %v2491_v7 = vshrl.u32 %v78_v6, 7  ;;  %v81_v8 = vand.u32 127, %v78_v6 }
  0x27   :  { %vm2494_vm9 = vcmp.ge.s32.totalorder %v2491_v7, %v81_v8 }
  0x8e   :  { %v88_v14 = vpop.xlane.xlu0 %87 }
  0x8f   :  { %v99_v15 = vmul.f32 %v2421_v13, %v88_v14 }
  0x91   :  { %v101_v16 = vsub.f32 %v2413_v3, %v99_v15 }
  0x93   :  { %v103_v17 = vmul.f32 %v101_v16, %v101_v16 }
  0x95   :  { %v105_v18 = vsel %vm85_vm0, %v103_v17, 0.0 }
  0x96   :  { %106 = vadd.xlane.f32.xlu1 %v105_v18  ;;  %v91_v19 = vpop.xlane.xlu0 %90 }
  0x97   :  { %v100_v20 = vmul.f32 %v2421_v13, %v91_v19 }
  0x99   :  { %v102_v21 = vsub.f32 %v2417_v5, %v100_v20 }
  0x9b   :  { %v104_v22 = vmul.f32 %v102_v21, %v102_v21 }
  0x9d   :  { %v108_v23 = vsel %vm85_vm0, %v104_v22, 0.0 }
  0x9e   :  { %109 = vadd.xlane.f32.xlu1 %v108_v23 }
 0x109   :  { %v107_v28 = vpop.xlane.xlu1 %106 }
 0x10a   :  { %v111_v29 = vmul.f32 %v107_v28, %v2421_v13 }
 0x10c   :  { %v113_v30 = vadd.f32 1e-05, %v111_v29 }
 0x10e   :  { %2149 = vrsqrt.f32 %v113_v30  ;;  %vm121_vm3 = vweird.f32 %v113_v30 }
 0x111   :  { %v110_v31 = vpop.xlane.xlu1 %109 }
 0x112   :  { %v112_v32 = vmul.f32 %v110_v31, %v2421_v13 }
 0x114   :  { %v2150_v33 = vpop.eup %2149  ;;  %v114_v34 = vadd.f32 1e-05, %v112_v32 }
 0x115   :  { %v116_v35 = vmul.f32 %v2150_v33, %v113_v30  ;;  %vm122_vm2 = vweird.f32 %v2150_v33 }
 0x116   :  { %2151 = vrsqrt.f32 %v114_v34  ;;  %vm123_vm4 = vmor %vm121_vm3, %vm122_vm2  ;;  %vm131_vm6 = vweird.f32 %v114_v34 }
 0x117   :  { %v117_v36 = vmul.f32 %v2150_v33, %v116_v35 }
 0x119   :  { %v118_v37 = vmul.f32 0.5, %v117_v36 }
 0x11b   :  { %v119_v38 = vsub.f32 1.5, %v118_v37 }
 0x11c   :  { %v2152_v39 = vpop.eup %2151 }
 0x11d   :  { %v120_v40 = vmul.f32 %v2150_v33, %v119_v38  ;;  %v126_v41 = vmul.f32 %v2152_v39, %v114_v34  ;;  %vm132_vm5 = vweird.f32 %v2152_v39 }
 0x11e   :  { %vm133_vm7 = vmor %vm131_vm6, %vm132_vm5 }
 0x11f   :  { %v124_v43 = vsel %vm123_vm4, %v2150_v33, %v120_v40  ;;  %v127_v44 = vmul.f32 %v2152_v39, %v126_v41 }
 0x120   :  { %v135_v45 = vmul.f32 %v124_v43, %v101_v16 }
 0x121   :  { %v128_v47 = vmul.f32 0.5, %v127_v44 }
 0x122   :  { %v140_v48 = vmul.f32 %v2129_v42, %v135_v45 }
 0x123   :  { %v129_v49 = vsub.f32 1.5, %v128_v47 }
 0x124   :  { %v145_v50 = vadd.f32 %v2130_v46, %v140_v48 }
 0x125   :  { %v130_v51 = vmul.f32 %v2152_v39, %v129_v49 }
 0x126   :  { %1990 = vmatmul.msk.f32.vlgmr.msra.gmra.mxu0 %vm85_vm0, %v145_v50 }
 0x127   :  { %v134_v52 = vsel %vm133_vm7, %v2152_v39, %v130_v51 }
 0x128   :  { %v136_v53 = vmul.f32 %v134_v52, %v102_v21 }
 0x12a   :  { %v141_v54 = vmul.f32 %v2129_v42, %v136_v53 }
 0x12c   :  { %v146_v55 = vadd.f32 %v2130_v46, %v141_v54 }
 0x12e   :  { %1991 = vmatmul.msk.f32.gmra.mxu0 %vm85_vm0, %v146_v55 }
 0x1a3   :  { %v178_v56 = vpop.f32.mrf.mxu0 }
 0x1a4   :  { %v2460_v60 = vadd.f32 %v2131_v57, %v178_v56 }
 0x1ab   :  { %v181_v58 = vpop.f32.mrf.mxu0 }
 0x1ac   :  { %v2454_v59 = vadd.f32 %v2131_v57, %v181_v58 }
 0x1ae   :  { %347 = vrot.lane.b32.xlu0 %v2454_v59, %s2291_s24  ;;  %213 = vrot.lane.b32.xlu2 %v2454_v59, %s2292_s25 }
 0x1b6   :  { %453 = vrot.lane.b32.xlu0 %v2460_v60, %s3031_s26  ;;  %349 = vrot.lane.b32.xlu2 %v2454_v59, %s2294_s27 }
 0x1be   :  { %589 = vrot.lane.b32.xlu0 %v2460_v60, %s3027_s28  ;;  %185 = vrot.lane.b32.xlu2 %v2460_v60, %s2292_s25 }
 0x1c6   :  { %427 = vrot.lane.b32.xlu0 %v2454_v59, %s2296_s29  ;;  %455 = vrot.lane.b32.xlu2 %v2460_v60, %s3029_s30 }
 0x1ce   :  { %481 = vrot.lane.b32.xlu0 %v2454_v59, %s3031_s26  ;;  %319 = vrot.lane.b32.xlu2 %v2460_v60, %s2291_s24 }
 0x1d6   :  { %615 = vrot.lane.b32.xlu0 %v2454_v59, %s3025_s0 }
 0x208   :  { %v214_v61 = vpop.permute.xlu2 %213 }
 0x209   :  { %1994 = vmatpush.xpose.msk.msra.mxu2 %vm187_vm8, %v214_v61 }
 0x20c   :  { %1995 = vmatmul.msk.f32.vlgmr.msra.gmra.mxu2 %vm187_vm8, %v2454_v59 }
 0x210   :  { %v350_v62 = vpop.permute.xlu2 %349 }
 0x211   :  { %2000 = vmatpush.xpose.msk.msrb.mxu2 %vm187_vm8, %v350_v62 }
 0x218   :  { %v186_v63 = vpop.permute.xlu2 %185 }
 0x219   :  { %1992 = vmatpush.xpose.msk.msra.mxu1 %vm187_vm8, %v186_v63 }
 0x21c   :  { %1993 = vmatmul.msk.f32.vlgmr.msra.gmra.mxu1 %vm187_vm8, %v2460_v60 }
 0x220   :  { %v348_v0 = vpop.permute.xlu0 %347  ;;  %v456_v1 = vpop.permute.xlu2 %455 }
 0x221   :  { %2001 = vmatmul.msk.f32.vlgmr.msrb.gmra.mxu2 %vm187_vm8, %v348_v0 }
 0x222   :  { %2004 = vmatpush.xpose.msk.msra.mxu2 %vm187_vm8, %v456_v1 }
 0x228   :  { %v454_v2 = vpop.permute.xlu0 %453  ;;  %v320_v37 = vpop.permute.xlu2 %319 }
 0x229   :  { %2005 = vmatmul.msk.f32.vlgmr.msra.gmra.mxu2 %vm187_vm8, %v454_v2 }
 0x230   :  { %v590_v4 = vpop.permute.xlu0 %589 }
 0x231   :  { %2010 = vmatpush.xpose.msk.msrb.mxu2 %vm187_vm8, %v590_v4 }
 0x238   :  { %v428_v19 = vpop.permute.xlu0 %427 }
 0x240   :  { %v482_v20 = vpop.permute.xlu0 %481 }
 0x248   :  { %v616_v23 = vpop.permute.xlu0 %615 }
 0x28f   :  { %v236_v9 = vpop.f32.mrf.mxu2 }
 0x290   :  { %v240_v11 = vmul.f32 0.35355338, %v236_v9 }
 0x292   :  { %v244_v12 = vsel %vm2494_vm9, %v240_v11, -1e+30 }
 0x293   :  { %v248_v14 = vsel %vm187_vm8, %v244_v12, -inf }
 0x294   :  { %249 = vmax.xlane.f32.xlu0 %v248_v14 }
 0x299   :  { %v209_v21 = vpop.f32.mrf.mxu1 }
 0x29a   :  { %v239_v22 = vmul.f32 0.35355338, %v209_v21 }
 0x29c   :  { %v243_v24 = vsel %vm2494_vm9, %v239_v22, -1e+30 }
 0x29d   :  { %v245_v25 = vsel %vm187_vm8, %v243_v24, -inf }
 0x2a4   :  { %v372_v15 = vpop.f32.mrf.mxu2 }
 0x2a5   :  { %v376_v16 = vmul.f32 0.35355338, %v372_v15 }
 0x2a7   :  { %v378_v17 = vsel %vm2494_vm9, %v376_v16, -1e+30 }
 0x2a8   :  { %v382_v18 = vsel %vm187_vm8, %v378_v17, -inf }
 0x2a9   :  { %383 = vmax.xlane.f32.xlu1 %v382_v18 }
 0x2ac   :  { %v478_v51 = vpop.f32.mrf.mxu2 }
 0x2ad   :  { %v509_v54 = vmul.f32 0.35355338, %v478_v51 }
 0x2af   :  { %v511_v55 = vsel %vm2494_vm9, %v509_v54, -1e+30 }
 0x2b0   :  { %v513_v57 = vsel %vm187_vm8, %v511_v55, -inf }
 0x2c2   :  { %321 = vrot.lane.b32.xlu1 %v2460_v60, %s2294_s27 }
 0x2ca   :  { %587 = vrot.lane.b32.xlu1 %v2460_v60, %s3025_s0 }
 0x2d2   :  { %483 = vrot.lane.b32.xlu1 %v2454_v59, %s3029_s30 }
 0x2da   :  { %617 = vrot.lane.b32.xlu1 %v2454_v59, %s3027_s28 }
 0x304   :  { %246 = vmax.xlane.f32.xlu1 %v245_v25 }
 0x307   :  { %v250_v26 = vpop.xlane.xlu0 %249 }
 0x308   :  { %v252_v27 = vsub.f32 %v244_v12, %v250_v26  ;;  %v2109_v26 = vpack.i.bf16 %v2454_v59, %v2460_v60 }
 0x30a   :  { %v255_v28 = vmul.f32 1.442695, %v252_v27 }
 0x30c   :  { %2153 = vpow2.f32 %v255_v28 }
 0x312   :  { %v2515_v29 = vpop.eup %2153 }
 0x313   :  { %v260_v30 = vsel %vm187_vm8, %v2515_v29, 0.0 }
 0x314   :  { %261 = vadd.xlane.f32.xlu0 %v260_v30 }
 0x31c   :  { %v384_v31 = vpop.xlane.xlu1 %383 }
 0x31d   :  { %v386_v32 = vsub.f32 %v378_v17, %v384_v31 }
 0x31f   :  { %v389_v33 = vmul.f32 1.442695, %v386_v32 }
 0x321   :  { %2155 = vpow2.f32 %v389_v33 }
 0x327   :  { %v2156_v34 = vpop.eup %2155 }
 0x328   :  { %v394_v35 = vsel %vm187_vm8, %v2156_v34, 0.0 }
 0x329   :  { %395 = vadd.xlane.f32.xlu2 %v394_v35 }
 0x334   :  { %v322_v36 = vpop.permute.xlu1 %321 }
 0x335   :  { %1998 = vmatpush.xpose.msk.msrb.mxu1 %vm187_vm8, %v322_v36 }
 0x338   :  { %1999 = vmatmul.msk.f32.vlgmr.msrb.gmra.mxu1 %vm187_vm8, %v320_v37 }
 0x339   :  { %448 = vmatpush.msra.mxu1 %v428_v19 }
 0x33c   :  { %v588_v38 = vpop.permute.xlu1 %587 }
 0x33d   :  { %2011 = vmatmul.msk.f32.vlgmr.msrb.gmra.mxu2 %vm187_vm8, %v588_v38 }
 0x344   :  { %v484_v39 = vpop.permute.xlu1 %483 }
 0x345   :  { %2006 = vmatpush.xpose.msk.msrb.mxu1 %vm187_vm8, %v484_v39 }
 0x34c   :  { %v618_v40 = vpop.permute.xlu1 %617 }
 0x34d   :  { %2012 = vmatpush.xpose.msk.msrb.mxu0 %vm187_vm8, %v618_v40 }
 0x350   :  { %2013 = vmatmul.msk.f32.vlgmr.msrb.gmra.mxu0 %vm187_vm8, %v616_v23 }
 0x377   :  { %v247_v41 = vpop.xlane.xlu1 %246 }
 0x378   :  { %v251_v42 = vsub.f32 %v243_v24, %v247_v41 }
 0x37a   :  { %v253_v43 = vmul.f32 1.442695, %v251_v42 }
 0x37c   :  { %2157 = vpow2.f32 %v253_v43 }
 0x382   :  { %v2526_v44 = vpop.eup %2157 }
 0x383   :  { %v257_v45 = vsel %vm187_vm8, %v2526_v44, 0.0 }
 0x384   :  { %258 = vadd.xlane.f32.xlu1 %v257_v45 }
 0x39c   :  { %v396_v46 = vpop.xlane.xlu2 %395 }
 0x39d   :  { %2159 = vrcp.f32 %v396_v46 }
 0x3a3   :  { %v2160_v47 = vpop.eup %2159 }
 0x3a4   :  { %v400_v48 = vmul.f32 %v2160_v47, %v2156_v34 }
 0x3a6   :  { %2003 = vmatmul.msk.f32.vlgmr.msra.gmra.mxu1 %vm187_vm8, %v400_v48 }
 0x3ae   :  { %2007 = vmatmul.msk.f32.vlgmr.msrb.gmra.mxu1 %vm187_vm8, %v482_v20 }
 0x3b5   :  { %v344_v49 = vpop.f32.mrf.mxu1 }
 0x3b6   :  { %v375_v50 = vmul.f32 0.35355338, %v344_v49 }
 0x3b8   :  { %v377_v52 = vsel %vm2494_vm9, %v375_v50, -1e+30 }
 0x3b9   :  { %v379_v53 = vsel %vm187_vm8, %v377_v52, -inf }
 0x3ba   :  { %380 = vmax.xlane.f32.xlu2 %v379_v53 }
 0x3c0   :  { %v612_v56 = vpop.f32.mrf.mxu2 }
 0x3c1   :  { %v643_v58 = vmul.f32 0.35355338, %v612_v56 }
 0x3c2   :  { %514 = vmax.xlane.f32.xlu2 %v513_v57 }
 0x3c3   :  { %v645_v61 = vsel %vm2494_vm9, %v643_v58, -1e+30 }
 0x3c4   :  { %v647_v62 = vsel %vm187_vm8, %v645_v61, -inf }
 0x3ca   :  { %648 = vmax.xlane.f32.xlu2 %v647_v62 }
 0x3cd   :  { %v640_v63 = vpop.f32.mrf.mxu0 }
 0x3ce   :  { %v644_v0 = vmul.f32 0.35355338, %v640_v63 }
 0x3d0   :  { %v646_v1 = vsel %vm2494_vm9, %v644_v0, -1e+30 }
 0x3d1   :  { %v650_v2 = vsel %vm187_vm8, %v646_v1, -inf }
 0x3d2   :  { %651 = vmax.xlane.f32.xlu2 %v650_v2 }
 0x3f7   :  { %v259_v35 = vpop.xlane.xlu1 %258 }
 0x423   :  { %v2544_v4 = vpop.f32.mrf.mxu1 }
 0x42b   :  { %v506_v6 = vpop.f32.mrf.mxu1 }
 0x42c   :  { %v510_v8 = vmul.f32 0.35355338, %v506_v6 }
 0x42d   :  { %v381_v9 = vpop.xlane.xlu2 %380 }
 0x42e   :  { %v385_v11 = vsub.f32 %v377_v52, %v381_v9  ;;  %v512_v12 = vsel %vm2494_vm9, %v510_v8, -1e+30 }
 0x42f   :  { %v516_v14 = vsel %vm187_vm8, %v512_v12, -inf }
 0x430   :  { %v387_v15 = vmul.f32 1.442695, %v385_v11  ;;  %517 = vmax.xlane.f32.xlu2 %v516_v14 }
 0x432   :  { %2161 = vpow2.f32 %v387_v15  ;;  %v756_v15 = vld [vmem:[%s3010_s7 + $0x18] sm:$0xff] }
 0x433   :  { %779 = vmatpush.msra.mxu2 %v756_v15 }
 0x435   :  { %v515_v16 = vpop.xlane.xlu2 %514 }
 0x436   :  { %v519_v17 = vsub.f32 %v511_v55, %v515_v16  ;;  %v755_v16 = vld [vmem:[%s3010_s7 + $0x10] sm:$0xff] }
 0x437   :  { %780 = vmatpush.msra.mxu2 %v755_v16 }
 0x438   :  { %v2162_v18 = vpop.eup %2161  ;;  %v521_v19 = vmul.f32 1.442695, %v519_v17  ;;  %v754_v17 = vld [vmem:[%s3010_s7 + $0x8] sm:$0xff] }
 0x439   :  { %v391_v20 = vsel %vm187_vm8, %v2162_v18, 0.0  ;;  %781 = vmatpush.msra.mxu2 %v754_v17 }
 0x43a   :  { %2163 = vpow2.f32 %v521_v19  ;;  %392 = vadd.xlane.f32.xlu1 %v391_v20 }
 0x43d   :  { %v649_v21 = vpop.xlane.xlu2 %648 }
 0x43e   :  { %v653_v22 = vsub.f32 %v645_v61, %v649_v21 }
 0x440   :  { %v2164_v23 = vpop.eup %2163  ;;  %v655_v24 = vmul.f32 1.442695, %v653_v22 }
 0x441   :  { %v525_v25 = vsel %vm187_vm8, %v2164_v23, 0.0 }
 0x442   :  { %2165 = vpow2.f32 %v655_v24  ;;  %526 = vadd.xlane.f32.xlu0 %v525_v25 }
 0x445   :  { %v652_v30 = vpop.xlane.xlu2 %651 }
 0x446   :  { %v654_v31 = vsub.f32 %v646_v1, %v652_v30 }
 0x448   :  { %v2166_v27 = vpop.eup %2165  ;;  %2110 = vrot.lane.b32.xlu2 %v2109_v26, %s2299_s19  ;;  %v657_v32 = vmul.f32 1.442695, %v654_v31 }
 0x449   :  { %v659_v28 = vsel %vm187_vm8, %v2166_v27, 0.0 }
 0x44a   :  { %660 = vadd.xlane.f32.xlu0 %v659_v28  ;;  %2167 = vpow2.f32 %v657_v32 }
 0x44b   :  { %2169 = vrcp.f32 %v259_v35 }
 0x450   :  { %v2168_v33 = vpop.eup %2167 }
 0x451   :  { %v662_v34 = vsel %vm187_vm8, %v2168_v33, 0.0  ;;  %v2170_v39 = vpop.eup %2169 }
 0x452   :  { %v265_v42 = vmul.f32 %v2170_v39, %v2526_v44 }
 0x453   :  { %401 = vrot.lane.b32.xlu1 %v2460_v60, %s2296_s29 }
 0x45b   :  { %669 = vrot.lane.b32.xlu1 %v2460_v60, %s3023_s1 }
 0x45e   :  { %535 = vrot.lane.b32.xlu0 %v2460_v60, %s3024_s20  ;;  %v262_v60 = vpop.xlane.xlu0 %261 }
 0x463   :  { %561 = vrot.lane.b32.xlu1 %v2454_v59, %s3024_s20  ;;  %s3053_s20 = smov 40  }
 0x46b   :  { %695 = vrot.lane.b32.xlu1 %v2454_v59, %s3023_s1 }
 0x488   :  { %663 = vadd.xlane.f32.xlu0 %v662_v34 }
 0x4a3   :  { %v518_v36 = vpop.xlane.xlu2 %517 }
 0x4a4   :  { %v520_v37 = vsub.f32 %v512_v12, %v518_v36 }
 0x4a6   :  { %v523_v38 = vmul.f32 1.442695, %v520_v37 }
 0x4a8   :  { %2171 = vpow2.f32 %v523_v38 }
 0x4a9   :  { %2173 = vrcp.f32 %v262_v60 }
 0x4ab   :  { %v2111_v40 = vpop.permute.xlu2 %2110 }
 0x4ac   :  { %v2112_v41 = vunpack.i.l.bf16 %v2111_v40  ;;  %v2113_v59 = vunpack.i.h.bf16 %v2111_v40 }
 0x4ad   :  { %v393_v48 = vpop.xlane.xlu1 %392 }
 0x4ae   :  { %v2172_v43 = vpop.eup %2171  ;;  %288 = vmatpush.msra.mxu3 %v2112_v41  ;;  %2175 = vrcp.f32 %v393_v48 }
 0x4af   :  { %1996 = vmatmul.msk.f32.vlgmr.msra.gmra.mxu3 %vm187_vm8, %v265_v42  ;;  %v528_v45 = vsel %vm187_vm8, %v2172_v43, 0.0  ;;  %v2174_v46 = vpop.eup %2173 }
 0x4b0   :  { %314 = vmatpush.msrb.mxu3 %v2113_v59  ;;  %529 = vadd.xlane.f32.xlu2 %v528_v45  ;;  %v266_v47 = vmul.f32 %v2174_v46, %v2515_v29 }
 0x4b4   :  { %v2176_v50 = vpop.eup %2175 }
 0x4b5   :  { %v527_v49 = vpop.xlane.xlu0 %526  ;;  %v399_v51 = vmul.f32 %v2176_v50, %v2162_v18  ;;  %v850_v50 = vld [vmem:[%s3014_s11 + $0x10] sm:$0xff] }
 0x4b6   :  { %2177 = vrcp.f32 %v527_v49  ;;  %v851_v49 = vld [vmem:[%s3014_s11 + $0x18] sm:$0xff] }
 0x4b7   :  { %1997 = vmatmul.msk.f32.vlgmr.msrb.gmra.mxu3 %vm187_vm8, %v266_v47 }
 0x4bc   :  { %v2178_v53 = vpop.eup %2177 }
 0x4bd   :  { %v661_v44 = vpop.xlane.xlu0 %660  ;;  %v533_v55 = vmul.f32 %v2178_v53, %v2164_v23 }
 0x4be   :  { %2179 = vrcp.f32 %v661_v44 }
 0x4c4   :  { %v2180_v29 = vpop.eup %2179 }
 0x4c5   :  { %v402_v52 = vpop.permute.xlu1 %401  ;;  %v667_v58 = vmul.f32 %v2180_v29, %v2166_v27 }
 0x4c6   :  { %422 = vmatpush.msra.mxu3 %v402_v52  ;;  %v848_v52 = vld [vmem:[%s3014_s11] sm:$0xff] }
 0x4c7   :  { %2002 = vmatmul.msk.f32.vlgmr.msra.gmra.mxu3 %vm187_vm8, %v399_v51  ;;  %v849_v51 = vld [vmem:[%s3014_s11 + $0x8] sm:$0xff] }
 0x4cd   :  { %v670_v54 = vpop.permute.xlu1 %669 }
 0x4d0   :  { %v536_v56 = vpop.permute.xlu0 %535 }
 0x4d1   :  { %556 = vmatpush.msrb.mxu3 %v536_v56 }
 0x4d2   :  { %2008 = vmatmul.msk.f32.vlgmr.msrb.gmra.mxu3 %vm187_vm8, %v533_v55 }
 0x4d3   :  { %690 = vmatpush.msra.mxu3 %v670_v54 }
 0x4d5   :  { %v562_v57 = vpop.permute.xlu1 %561  ;;  %874 = vmatpush.msrb.mxu3 %v851_v49 }
 0x4d6   :  { %582 = vmatpush.msra.mxu1 %v562_v57 }
 0x4d7   :  { %875 = vmatpush.msrb.mxu3 %v850_v50 }
 0x4d9   :  { %876 = vmatpush.msrb.mxu3 %v849_v51 }
 0x4da   :  { %2014 = vmatmul.msk.f32.vlgmr.msra.gmra.mxu3 %vm187_vm8, %v667_v58 }
 0x4db   :  { %877 = vmatpush.msrb.mxu3 %v848_v52 }
 0x4dd   :  { %v696_v61 = vpop.permute.xlu1 %695 }
 0x4de   :  { %716 = vmatpush.msrb.mxu1 %v696_v61 }
 0x4fb   :  { %v664_v63 = vpop.xlane.xlu0 %663 }
 0x523   :  { %v530_v62 = vpop.xlane.xlu2 %529 }
 0x524   :  { %2181 = vrcp.f32 %v530_v62  ;;  %v2133_v62 = vld [vmem:[%s3012_s9] ss:$0 sm:$0xff] }
 0x525   :  { %2183 = vrcp.f32 %v664_v63 }
 0x52a   :  { %v2182_v0 = vpop.eup %2181 }
 0x52b   :  { %v534_v1 = vmul.f32 %v2182_v0, %v2172_v43  ;;  %v2184_v2 = vpop.eup %2183 }
 0x52c   :  { %v668_v6 = vmul.f32 %v2184_v2, %v2168_v33  ;;  %v2132_v33 = vld [vmem:[%s3011_s8] ss:$0 sm:$0xff] }
 0x52d   :  { %2009 = vmatmul.msk.f32.vlgmr.msra.gmra.mxu1 %vm187_vm8, %v534_v1  ;;  %v2134_v1 = vld [vmem:[%s3013_s10] ss:$0 sm:$0xff] }
 0x532   :  { %v290_v8 = vpop.f32.mrf.mxu3 }
 0x535   :  { %2015 = vmatmul.msk.f32.vlgmr.msrb.gmra.mxu1 %vm187_vm8, %v668_v6 }
 0x53a   :  { %v316_v9 = vpop.f32.mrf.mxu3 }
 0x54a   :  { %v424_v11 = vpop.f32.mrf.mxu3 }
 0x54b   :  { %723 = vrot.lane.b32.xlu1 %v424_v11, %s3033_s21 }
 0x555   :  { %v558_v12 = vpop.f32.mrf.mxu3 }
 0x556   :  { %731 = vrot.lane.b32.xlu2 %v558_v12, %s3037_s22 }
 0x55d   :  { %v692_v14 = vpop.f32.mrf.mxu3 }
 0x55e   :  { %739 = vrot.lane.b32.xlu1 %v692_v14, %s3035_s2 }
 0x566   :  { %725 = vrot.lane.b32.xlu1 %v2544_v4, %s3033_s21  ;;  %v753_v4 = vld [vmem:[%s3010_s7] sm:$0xff] }
 0x567   :  { %782 = vmatpush.msra.mxu2 %v753_v4 }
 0x5aa   :  { %v584_v18 = vpop.f32.mrf.mxu1 }
 0x5ab   :  { %733 = vrot.lane.b32.xlu0 %v584_v18, %s3037_s22  ;;  %s3054_s22 = smov 16  }
 0x5b0   :  { %v732_v22 = vpop.permute.xlu2 %731 }
 0x5b2   :  { %v718_v19 = vpop.f32.mrf.mxu1 }
 0x5b3   :  { %741 = vrot.lane.b32.xlu1 %v718_v19, %s3035_s2  ;;  %s3055_s2 = smov 24  }
 0x5bd   :  { %v724_v20 = vpop.permute.xlu1 %723 }
 0x5be   :  { %v745_v21 = vsel %vm187_vm8, %v290_v8, %v724_v20 }
 0x5bf   :  { %v748_v23 = vsel %vm747_vm10, %v745_v21, %v732_v22  ;;  %v942_v22 = vld [vmem:[%s3016_s13 + $0x78] sm:$0xff] }
 0x5c0   :  { %947 = vmatpush.msra.mxu3 %v942_v22 }
 0x5d0   :  { %v740_v24 = vpop.permute.xlu1 %739 }
 0x5d1   :  { %v751_v25 = vsel %vm750_vm11, %v748_v23, %v740_v24  ;;  %v941_v23 = vld [vmem:[%s3016_s13 + $0x70] sm:$0xff]  ;;  %v940_v24 = vld [vmem:[%s3016_s13 + $0x68] sm:$0xff] }
 0x5d2   :  { %2016 = vmatmul.msk.f32.vlgmr.msra.gmra.mxu2 %vm85_vm0, %v751_v25  ;;  %948 = vmatpush.msra.mxu3 %v941_v23  ;;  %v939_v25 = vld [vmem:[%s3016_s13 + $0x60] sm:$0xff] }
 0x5d4   :  { %949 = vmatpush.msra.mxu3 %v940_v24 }
 0x5d6   :  { %950 = vmatpush.msra.mxu3 %v939_v25 }
 0x5d8   :  { %v726_v26 = vpop.permute.xlu1 %725 }
 0x5d9   :  { %v746_v28 = vsel %vm187_vm8, %v316_v9, %v726_v26  ;;  %v938_v26 = vld [vmem:[%s3016_s13 + $0x58] sm:$0xff] }
 0x5da   :  { %951 = vmatpush.msra.mxu3 %v938_v26 }
 0x61d   :  { %v734_v27 = vpop.permute.xlu0 %733 }
 0x61e   :  { %v749_v30 = vsel %vm747_vm10, %v746_v28, %v734_v27  ;;  %v937_v27 = vld [vmem:[%s3016_s13 + $0x50] sm:$0xff]  ;;  %v936_v28 = vld [vmem:[%s3016_s13 + $0x48] sm:$0xff] }
 0x61f   :  { %952 = vmatpush.msra.mxu3 %v937_v27 }
 0x621   :  { %953 = vmatpush.msra.mxu3 %v936_v28 }
 0x625   :  { %v742_v31 = vpop.permute.xlu1 %741 }
 0x626   :  { %v752_v32 = vsel %vm750_vm11, %v749_v30, %v742_v31  ;;  %v935_v30 = vld [vmem:[%s3016_s13 + $0x40] sm:$0xff]  ;;  %v934_v31 = vld [vmem:[%s3016_s13 + $0x38] sm:$0xff] }
 0x627   :  { %2017 = vmatmul.msk.f32.gmra.mxu2 %vm85_vm0, %v752_v32  ;;  %954 = vmatpush.msra.mxu3 %v935_v30  ;;  %v933_v32 = vld [vmem:[%s3016_s13 + $0x30] sm:$0xff] }
 0x629   :  { %955 = vmatpush.msra.mxu3 %v934_v31 }
 0x62b   :  { %956 = vmatpush.msra.mxu3 %v933_v32  ;;  %v2027_v32 = vld [vmem:[%s3008_s5 + $0x38] sm:$0xff] }
 0x62c   :  { %1058 = vmatpush.msra.mxu1 %v2027_v32 }
 0x655   :  { %v784_v34 = vpop.f32.mrf.mxu2 }
 0x656   :  { %v785_v35 = vadd.f32 %v2132_v33, %v784_v34  ;;  %v931_v34 = vld [vmem:[%s3016_s13 + $0x20] sm:$0xff] }
 0x658   :  { %v2607_v36 = vadd.f32 %v785_v35, %v2413_v3  ;;  %v930_v35 = vld [vmem:[%s3016_s13 + $0x18] sm:$0xff] }
 0x65a   :  { %v794_v37 = vsel %vm85_vm0, %v2607_v36, 0.0 }
 0x65b   :  { %795 = vadd.xlane.f32.xlu2 %v794_v37  ;;  %v2135_v37 = vld [vmem:[%s3015_s12] ss:$0 sm:$0xff] }
 0x6aa   :  { %v787_v38 = vpop.f32.mrf.mxu2 }
 0x6ab   :  { %v788_v60 = vadd.f32 %v2132_v33, %v787_v38  ;;  %v932_v33 = vld [vmem:[%s3016_s13 + $0x28] sm:$0xff]  ;;  %v929_v38 = vld [vmem:[%s3016_s13 + $0x10] sm:$0xff] }
 0x6ac   :  { %957 = vmatpush.msra.mxu3 %v932_v33  ;;  %v2026_v33 = vld [vmem:[%s3008_s5 + $0x30] sm:$0xff] }
 0x6ad   :  { %v2612_v39 = vadd.f32 %v788_v60, %v2417_v5  ;;  %1059 = vmatpush.msra.mxu1 %v2026_v33 }
 0x6ae   :  { %958 = vmatpush.msra.mxu3 %v931_v34  ;;  %v2025_v34 = vld [vmem:[%s3008_s5 + $0x28] sm:$0xff] }
 0x6af   :  { %v797_v40 = vsel %vm85_vm0, %v2612_v39, 0.0  ;;  %1060 = vmatpush.msra.mxu1 %v2025_v34 }
 0x6b0   :  { %798 = vadd.xlane.f32.xlu1 %v797_v40  ;;  %959 = vmatpush.msra.mxu3 %v930_v35  ;;  %v928_v40 = vld [vmem:[%s3016_s13 + $0x8] sm:$0xff]  ;;  %v2024_v35 = vld [vmem:[%s3008_s5 + $0x20] sm:$0xff] }
 0x6b1   :  { %1061 = vmatpush.msra.mxu1 %v2024_v35 }
 0x6b2   :  { %960 = vmatpush.msra.mxu3 %v929_v38 }
 0x6b4   :  { %961 = vmatpush.msra.mxu3 %v928_v40 }
 0x6ce   :  { %v796_v41 = vpop.xlane.xlu2 %795 }
 0x6cf   :  { %v800_v59 = vmul.f32 %v796_v41, %v2421_v13 }
 0x6d1   :  { %v802_v42 = vsub.f32 %v2607_v36, %v800_v59  ;;  %v927_v59 = vld [vmem:[%s3016_s13] sm:$0xff] }
 0x6d2   :  { %962 = vmatpush.msra.mxu3 %v927_v59 }
 0x6d3   :  { %v804_v3 = vmul.f32 %v802_v42, %v802_v42 }
 0x6d5   :  { %v806_v43 = vsel %vm85_vm0, %v804_v3, 0.0 }
 0x6d6   :  { %807 = vadd.xlane.f32.xlu0 %v806_v43 }
 0x723   :  { %v799_v45 = vpop.xlane.xlu1 %798 }
 0x724   :  { %v801_v46 = vmul.f32 %v799_v45, %v2421_v13 }
 0x726   :  { %v803_v47 = vsub.f32 %v2612_v39, %v801_v46 }
 0x728   :  { %v805_v5 = vmul.f32 %v803_v47, %v803_v47 }
 0x72a   :  { %v809_v48 = vsel %vm85_vm0, %v805_v5, 0.0 }
 0x72b   :  { %810 = vadd.xlane.f32.xlu2 %v809_v48 }
 0x749   :  { %v808_v44 = vpop.xlane.xlu0 %807 }
 0x74a   :  { %v812_v53 = vmul.f32 %v808_v44, %v2421_v13 }
 0x74c   :  { %v814_v54 = vadd.f32 1e-05, %v812_v53 }
 0x74e   :  { %2185 = vrsqrt.f32 %v814_v54  ;;  %vm822_vm13 = vweird.f32 %v814_v54 }
 0x754   :  { %v2186_v55 = vpop.eup %2185 }
 0x755   :  { %v817_v56 = vmul.f32 %v2186_v55, %v814_v54  ;;  %vm823_vm12 = vweird.f32 %v2186_v55 }
 0x756   :  { %vm824_vm14 = vmor %vm822_vm13, %vm823_vm12 }
 0x757   :  { %v818_v29 = vmul.f32 %v2186_v55, %v817_v56 }
 0x759   :  { %v819_v57 = vmul.f32 0.5, %v818_v29 }
 0x75b   :  { %v820_v58 = vsub.f32 1.5, %v819_v57 }
 0x75d   :  { %v821_v61 = vmul.f32 %v2186_v55, %v820_v58 }
 0x75f   :  { %v825_v63 = vsel %vm824_vm14, %v2186_v55, %v821_v61 }
 0x760   :  { %v836_v0 = vmul.f32 %v825_v63, %v802_v42 }
 0x762   :  { %v841_v2 = vmul.f32 %v2133_v62, %v836_v0 }
 0x764   :  { %v846_v6 = vadd.f32 %v2134_v1, %v841_v2 }
 0x766   :  { %2018 = vmatmul.msk.f32.vlgmr.msrb.gmra.mxu3 %vm85_vm0, %v846_v6 }
 0x79e   :  { %v811_v8 = vpop.xlane.xlu2 %810 }
 0x79f   :  { %v813_v9 = vmul.f32 %v811_v8, %v2421_v13 }
 0x7a1   :  { %v815_v11 = vadd.f32 1e-05, %v813_v9 }
 0x7a3   :  { %2187 = vrsqrt.f32 %v815_v11  ;;  %vm832_vm1 = vweird.f32 %v815_v11 }
 0x7a9   :  { %v2188_v12 = vpop.eup %2187 }
 0x7aa   :  { %v827_v14 = vmul.f32 %v2188_v12, %v815_v11  ;;  %vm833_vm15 = vweird.f32 %v2188_v12 }
 0x7ab   :  { %vm834_vm2 = vmor %vm832_vm1, %vm833_vm15 }
 0x7ac   :  { %v828_v15 = vmul.f32 %v2188_v12, %v827_v14 }
 0x7ae   :  { %v829_v16 = vmul.f32 0.5, %v828_v15  ;;  %v2136_v15 = vld [vmem:[%s3017_s14] ss:$0 sm:$0xff] }
 0x7b0   :  { %v830_v17 = vsub.f32 1.5, %v829_v16 }
 0x7b2   :  { %v831_v18 = vmul.f32 %v2188_v12, %v830_v17 }
 0x7b4   :  { %v835_v4 = vsel %vm834_vm2, %v2188_v12, %v831_v18 }
 0x7b5   :  { %v837_v19 = vmul.f32 %v835_v4, %v803_v47 }
 0x7b7   :  { %v842_v20 = vmul.f32 %v2133_v62, %v837_v19 }
 0x7b9   :  { %v847_v21 = vadd.f32 %v2134_v1, %v842_v20 }
 0x7bb   :  { %2019 = vmatmul.msk.f32.gmra.mxu3 %vm85_vm0, %v847_v21 }
 0x7e9   :  { %v879_v60 = vpop.f32.mrf.mxu3 }
 0x7ea   :  { %v880_v41 = vadd.f32 %v2135_v37, %v879_v60 }
 0x7ec   :  { %v2020_v42 = vmul.f32 -1.702, %v880_v41 }
 0x7ee   :  { %v889_v3 = vmul.f32 1.442695, %v2020_v42 }
 0x7f0   :  { %2189 = vpow2.f32 %v889_v3 }
 0x7f6   :  { %v2190_v43 = vpop.eup %2189 }
 0x7f7   :  { %v893_v45 = vadd.f32 1.0, %v2190_v43 }
 0x7f9   :  { %2191 = vrcp.f32 %v893_v45  ;;  %v906_v48 = vand.u32 2147483648, %v893_v45  ;;  %v904_v50 = vand.u32 2147483647, %v893_v45  ;;  %vm900_vm4 = vweird.f32 %v893_v45 }
 0x7fb   :  { %v907_v52 = vor.u32 1.1754944e-38, %v906_v48  ;;  %vm905_vm6 = vcmp.eq.f32.partialorder %v904_v50, 8.507059e+37 }
 0x7ff   :  { %v2192_v46 = vpop.eup %2191 }
 0x800   :  { %v896_v47 = vmul.f32 %v2192_v46, %v893_v45  ;;  %vm901_vm3 = vweird.f32 %v2192_v46  ;;  %v2137_v45 = vld [vmem:[%s3006_s3 + $0x1] ss:$0 sm:$0xff] }
 0x801   :  { %vm902_vm5 = vmor %vm900_vm4, %vm901_vm3 }
 0x802   :  { %v897_v5 = vsub.f32 1.0, %v896_v47 }
 0x804   :  { %v898_v49 = vmul.f32 %v2192_v46, %v897_v5  ;;  %v2138_v5 = vld [vmem:[%s3007_s4 + $0x1] ss:$0 sm:$0xff] }
 0x806   :  { %v899_v51 = vadd.f32 %v2192_v46, %v898_v49 }
 0x808   :  { %v903_v44 = vsel %vm902_vm5, %v2192_v46, %v899_v51 }
 0x809   :  { %v908_v53 = vsel %vm905_vm6, %v907_v52, %v903_v44 }
 0x80a   :  { %v925_v54 = vmul.f32 %v908_v53, %v880_v41 }
 0x80c   :  { %963 = vmatmul.f32.vlgmr.msra.gmra.mxu3 %v925_v54 }
 0x83e   :  { %v882_v55 = vpop.f32.mrf.mxu3 }
 0x83f   :  { %v883_v56 = vadd.f32 %v2135_v37, %v882_v55 }
 0x841   :  { %v2021_v29 = vmul.f32 -1.702, %v883_v56 }
 0x843   :  { %v891_v57 = vmul.f32 1.442695, %v2021_v29 }
 0x845   :  { %2193 = vpow2.f32 %v891_v57 }
 0x84b   :  { %v2194_v58 = vpop.eup %2193 }
 0x84c   :  { %v894_v61 = vadd.f32 1.0, %v2194_v58 }
 0x84e   :  { %2195 = vrcp.f32 %v894_v61  ;;  %v921_v1 = vand.u32 2147483648, %v894_v61  ;;  %v919_v6 = vand.u32 2147483647, %v894_v61  ;;  %vm915_vm12 = vweird.f32 %v894_v61 }
 0x850   :  { %v922_v9 = vor.u32 1.1754944e-38, %v921_v1  ;;  %vm920_vm14 = vcmp.eq.f32.partialorder %v919_v6, 8.507059e+37 }
 0x854   :  { %v2196_v62 = vpop.eup %2195 }
 0x855   :  { %v911_v63 = vmul.f32 %v2196_v62, %v894_v61  ;;  %vm916_vm7 = vweird.f32 %v2196_v62 }
 0x856   :  { %vm917_vm13 = vmor %vm915_vm12, %vm916_vm7 }
 0x857   :  { %v912_v0 = vsub.f32 1.0, %v911_v63  ;;  %v2139_v63 = vld [vmem:[%s3009_s6 + $0x1] ss:$0 sm:$0xff]  ;;  %s3047_s6 = smov 112  }
 0x859   :  { %v913_v2 = vmul.f32 %v2196_v62, %v912_v0 }
 0x85b   :  { %v914_v8 = vadd.f32 %v2196_v62, %v913_v2 }
 0x85d   :  { %v918_v11 = vsel %vm917_vm13, %v2196_v62, %v914_v8 }
 0x85e   :  { %v923_v12 = vsel %vm920_vm14, %v922_v9, %v918_v11 }
 0x85f   :  { %v926_v14 = vmul.f32 %v923_v12, %v883_v56 }
 0x861   :  { %966 = vmatmul.f32.gmra.mxu3 %v926_v14 }
 0x88f   :  { %v964_v16 = vpop.f32.mrf.mxu3 }
 0x890   :  { %v965_v17 = vadd.f32 %v2136_v15, %v964_v16 }
 0x892   :  { %v2699_v18 = vadd.f32 %v965_v17, %v2607_v36 }
 0x894   :  { %v976_v4 = vsel %vm85_vm0, %v2699_v18, 0.0 }
 0x895   :  { %977 = vadd.xlane.f32.xlu1 %v976_v4 }
 0x8e4   :  { %v967_v19 = vpop.f32.mrf.mxu3 }
 0x8e5   :  { %v968_v20 = vadd.f32 %v2136_v15, %v967_v19 }
 0x8e7   :  { %v2704_v21 = vadd.f32 %v968_v20, %v2612_v39 }
 0x8e9   :  { %v979_v22 = vsel %vm85_vm0, %v2704_v21, 0.0 }
 0x8ea   :  { %980 = vadd.xlane.f32.xlu2 %v979_v22 }
 0x908   :  { %v978_v23 = vpop.xlane.xlu1 %977 }
 0x909   :  { %v982_v24 = vmul.f32 %v978_v23, %v2421_v13 }
 0x90b   :  { %v984_v25 = vsub.f32 %v2699_v18, %v982_v24 }
 0x90d   :  { %v986_v36 = vmul.f32 %v984_v25, %v984_v25 }
 0x90f   :  { %v988_v26 = vsel %vm85_vm0, %v986_v36, 0.0 }
 0x910   :  { %989 = vadd.xlane.f32.xlu1 %v988_v26 }
 0x95d   :  { %v981_v27 = vpop.xlane.xlu2 %980 }
 0x95e   :  { %v983_v28 = vmul.f32 %v981_v27, %v2421_v13 }
 0x960   :  { %v985_v30 = vsub.f32 %v2704_v21, %v983_v28 }
 0x962   :  { %v987_v39 = vmul.f32 %v985_v30, %v985_v30 }
 0x964   :  { %v991_v31 = vsel %vm85_vm0, %v987_v39, 0.0 }
 0x965   :  { %992 = vadd.xlane.f32.xlu0 %v991_v31 }
 0x983   :  { %v990_v37 = vpop.xlane.xlu1 %989 }
 0x984   :  { %v994_v38 = vmul.f32 %v990_v37, %v2421_v13 }
 0x986   :  { %v996_v60 = vadd.f32 1e-05, %v994_v38 }
 0x988   :  { %2197 = vrsqrt.f32 %v996_v60  ;;  %vm1004_vm1 = vweird.f32 %v996_v60 }
 0x98e   :  { %v2198_v40 = vpop.eup %2197 }
 0x98f   :  { %v999_v41 = vmul.f32 %v2198_v40, %v996_v60  ;;  %vm1005_vm15 = vweird.f32 %v2198_v40 }
 0x990   :  { %vm1006_vm2 = vmor %vm1004_vm1, %vm1005_vm15 }
 0x991   :  { %v1000_v59 = vmul.f32 %v2198_v40, %v999_v41 }
 0x993   :  { %v1001_v42 = vmul.f32 0.5, %v1000_v59 }
 0x995   :  { %v1002_v3 = vsub.f32 1.5, %v1001_v42 }
 0x997   :  { %v1003_v43 = vmul.f32 %v2198_v40, %v1002_v3 }
 0x999   :  { %v1007_v46 = vsel %vm1006_vm2, %v2198_v40, %v1003_v43 }
 0x99a   :  { %v1018_v47 = vmul.f32 %v1007_v46, %v984_v25 }
 0x99c   :  { %v1023_v48 = vmul.f32 %v2137_v45, %v1018_v47 }
 0x99e   :  { %v1028_v49 = vadd.f32 %v2138_v5, %v1023_v48 }
 0x9a0   :  { %2029 = vmatmul.msk.f32.vlgmr.msra.gmra.mxu1 %vm85_vm0, %v1028_v49 }
 0x9d8   :  { %v993_v50 = vpop.xlane.xlu0 %992 }
 0x9d9   :  { %v995_v51 = vmul.f32 %v993_v50, %v2421_v13 }
 0x9db   :  { %v997_v52 = vadd.f32 1e-05, %v995_v51 }
 0x9dd   :  { %2199 = vrsqrt.f32 %v997_v52  ;;  %vm1014_vm4 = vweird.f32 %v997_v52 }
 0x9e3   :  { %v2200_v44 = vpop.eup %2199 }
 0x9e4   :  { %v1009_v53 = vmul.f32 %v2200_v44, %v997_v52  ;;  %vm1015_vm3 = vweird.f32 %v2200_v44 }
 0x9e5   :  { %vm1016_vm5 = vmor %vm1014_vm4, %vm1015_vm3 }
 0x9e6   :  { %v1010_v54 = vmul.f32 %v2200_v44, %v1009_v53 }
 0x9e8   :  { %v1011_v55 = vmul.f32 0.5, %v1010_v54 }
 0x9ea   :  { %v1012_v56 = vsub.f32 1.5, %v1011_v55 }
 0x9ec   :  { %v1013_v29 = vmul.f32 %v2200_v44, %v1012_v56 }
 0x9ee   :  { %v1017_v57 = vsel %vm1016_vm5, %v2200_v44, %v1013_v29 }
 0x9ef   :  { %v1019_v58 = vmul.f32 %v1017_v57, %v985_v30 }
 0x9f1   :  { %v1024_v61 = vmul.f32 %v2137_v45, %v1019_v58 }
 0x9f3   :  { %v1029_v62 = vadd.f32 %v2138_v5, %v1024_v61 }
 0x9f5   :  { %2030 = vmatmul.msk.f32.gmra.mxu1 %vm85_vm0, %v1029_v62 }
 0xa1d   :  { %v1063_v0 = vpop.f32.mrf.mxu1 }
 0xa1e   :  { %v2739_v1 = vadd.f32 %v2139_v63, %v1063_v0 }
 0xa20   :  { %1070 = vrot.lane.b32.xlu2 %v2739_v1, %s2292_s25  ;;  %1203 = vrot.lane.b32.xlu0 %v2739_v1, %s2294_s27 }
 0xa28   :  { %1201 = vrot.lane.b32.xlu2 %v2739_v1, %s2291_s24 }
 0xa72   :  { %v1066_v2 = vpop.f32.mrf.mxu1 }
 0xa73   :  { %v2747_v6 = vadd.f32 %v2139_v63, %v1066_v2 }
 0xa75   :  { %1231 = vrot.lane.b32.xlu2 %v2747_v6, %s2294_s27  ;;  %1097 = vrot.lane.b32.xlu1 %v2747_v6, %s2292_s25  ;;  %v2114_v8 = vpack.i.bf16 %v2739_v1, %v2747_v6  ;;  %s3049_s25 = smov 72   ;;  %s3050_s27 = smov 104  }
 0xa77   :  { %2115 = vrot.lane.b32.xlu0 %v2114_v8, %s2299_s19  ;;  %s3051_s19 = smov 8  }
 0xa7a   :  { %v1071_v9 = vpop.permute.xlu2 %1070 }
 0xa7b   :  { %2031 = vmatpush.xpose.msk.msrb.mxu2 %vm187_vm8, %v1071_v9 }
 0xa7d   :  { %1283 = vrot.lane.b32.xlu1 %v2739_v1, %s2296_s29 }
 0xa7e   :  { %2032 = vmatmul.msk.f32.vlgmr.msrb.gmra.mxu2 %vm187_vm8, %v2739_v1 }
 0xa7f   :  { %1229 = vrot.lane.b32.xlu0 %v2747_v6, %s2291_s24  ;;  %s3048_s24 = smov 80  }
 0xa82   :  { %v1202_v12 = vpop.permute.xlu2 %1201 }
 0xa87   :  { %1363 = vrot.lane.b32.xlu0 %v2747_v6, %s3047_s6 }
 0xa92   :  { %v1204_v11 = vpop.permute.xlu0 %1203 }
 0xacf   :  { %v1232_v4 = vpop.permute.xlu2 %1231 }
 0xae7   :  { %v1098_v14 = vpop.permute.xlu1 %1097 }
 0xae8   :  { %2033 = vmatpush.xpose.msk.msra.mxu0 %vm187_vm8, %v1098_v14 }
 0xae9   :  { %v2116_v15 = vpop.permute.xlu0 %2115 }
 0xaea   :  { %v2118_v16 = vunpack.i.h.bf16 %v2116_v15  ;;  %v2117_v17 = vunpack.i.l.bf16 %v2116_v15 }
 0xaeb   :  { %2034 = vmatmul.msk.f32.vlgmr.msra.gmra.mxu0 %vm187_vm8, %v2747_v6 }
 0xaec   :  { %2037 = vmatpush.xpose.msk.msrb.mxu0 %vm187_vm8, %v1204_v11  ;;  %1170 = vmatpush.msrb.mxu1 %v2118_v16 }
 0xaed   :  { %1196 = vmatpush.msra.mxu2 %v2117_v17 }
 0xaee   :  { %2039 = vmatpush.xpose.msk.msra.mxu1 %vm187_vm8, %v1232_v4 }
 0xaef   :  { %v1284_v19 = vpop.permute.xlu1 %1283 }
 0xaf0   :  { %1304 = vmatpush.msrb.mxu2 %v1284_v19 }
 0xaf1   :  { %v1230_v38 = vpop.permute.xlu0 %1229 }
 0xaf3   :  { %2038 = vmatmul.msk.f32.vlgmr.msrb.gmra.mxu0 %vm187_vm8, %v1202_v12 }
 0xaf9   :  { %v1364_v60 = vpop.permute.xlu0 %1363 }
 0xb01   :  { %v1093_v20 = vpop.f32.mrf.mxu2 }
 0xb02   :  { %v1123_v22 = vmul.f32 0.35355338, %v1093_v20 }
 0xb04   :  { %v1125_v23 = vsel %vm2494_vm9, %v1123_v22, -1e+30 }
 0xb05   :  { %v1127_v24 = vsel %vm187_vm8, %v1125_v23, -inf }
 0xb06   :  { %1128 = vmax.xlane.f32.xlu1 %v1127_v24 }
 0xb1f   :  { %1365 = vrot.lane.b32.xlu1 %v2747_v6, %s3048_s24 }
 0xb68   :  { %v1120_v25 = vpop.f32.mrf.mxu0 }
 0xb69   :  { %v1124_v36 = vmul.f32 0.35355338, %v1120_v25 }
 0xb6b   :  { %v1126_v26 = vsel %vm2494_vm9, %v1124_v36, -1e+30 }
 0xb6c   :  { %v1130_v27 = vsel %vm187_vm8, %v1126_v26, -inf }
 0xb6d   :  { %1131 = vmax.xlane.f32.xlu0 %v1130_v27 }
 0xb70   :  { %v1226_v28 = vpop.f32.mrf.mxu0 }
 0xb71   :  { %v1257_v30 = vmul.f32 0.35355338, %v1226_v28 }
 0xb73   :  { %v1259_v39 = vsel %vm2494_vm9, %v1257_v30, -1e+30 }
 0xb74   :  { %v1261_v31 = vsel %vm187_vm8, %v1259_v39, -inf }
 0xb75   :  { %1262 = vmax.xlane.f32.xlu2 %v1261_v31 }
 0xb79   :  { %v1129_v32 = vpop.xlane.xlu1 %1128 }
 0xb7a   :  { %v1133_v33 = vsub.f32 %v1125_v23, %v1129_v32 }
 0xb7c   :  { %v1135_v34 = vmul.f32 1.442695, %v1133_v33 }
 0xb7e   :  { %2201 = vpow2.f32 %v1135_v34 }
 0xb81   :  { %1499 = vrot.lane.b32.xlu0 %v2747_v6, %s3049_s25 }
 0xb84   :  { %v2202_v35 = vpop.eup %2201 }
 0xb85   :  { %v1139_v37 = vsel %vm187_vm8, %v2202_v35, 0.0 }
 0xb86   :  { %1140 = vadd.xlane.f32.xlu1 %v1139_v37 }
 0xb8d   :  { %1337 = vrot.lane.b32.xlu2 %v2739_v1, %s3048_s24 }
 0xb91   :  { %v1366_v47 = vpop.permute.xlu1 %1365 }
 0xb9f   :  { %1335 = vrot.lane.b32.xlu1 %v2739_v1, %s3047_s6 }
 0xba7   :  { %1471 = vrot.lane.b32.xlu1 %v2739_v1, %s3049_s25 }
 0xbe0   :  { %v1132_v40 = vpop.xlane.xlu0 %1131 }
 0xbe1   :  { %v1134_v41 = vsub.f32 %v1126_v26, %v1132_v40 }
 0xbe3   :  { %v1137_v59 = vmul.f32 1.442695, %v1134_v41 }
 0xbe5   :  { %2203 = vpow2.f32 %v1137_v59 }
 0xbe8   :  { %v1263_v42 = vpop.xlane.xlu2 %1262 }
 0xbe9   :  { %v1267_v3 = vsub.f32 %v1259_v39, %v1263_v42 }
 0xbeb   :  { %v2204_v43 = vpop.eup %2203  ;;  %v1269_v45 = vmul.f32 1.442695, %v1267_v3 }
 0xbec   :  { %v1142_v46 = vsel %vm187_vm8, %v2204_v43, 0.0 }
 0xbed   :  { %2205 = vpow2.f32 %v1269_v45  ;;  %1143 = vadd.xlane.f32.xlu0 %v1142_v46 }
 0xbf0   :  { %v1338_v52 = vpop.permute.xlu2 %1337 }
 0xbf3   :  { %v2206_v5 = vpop.eup %2205  ;;  %v1500_v54 = vpop.permute.xlu0 %1499 }
 0xbf4   :  { %v1273_v48 = vsel %vm187_vm8, %v2206_v5, 0.0 }
 0xbf5   :  { %1274 = vadd.xlane.f32.xlu2 %v1273_v48 }
 0xbf9   :  { %v1141_v49 = vpop.xlane.xlu1 %1140 }
 0xbfa   :  { %2207 = vrcp.f32 %v1141_v49 }
 0xc00   :  { %v2208_v50 = vpop.eup %2207 }
 0xc01   :  { %v1147_v51 = vmul.f32 %v2208_v50, %v2202_v35  ;;  %1469 = vrot.lane.b32.xlu0 %v2739_v1, %s3050_s27 }
 0xc03   :  { %2035 = vmatmul.msk.f32.vlgmr.msrb.gmra.mxu1 %vm187_vm8, %v1147_v51 }
 0xc04   :  { %2043 = vmatpush.xpose.msk.msrb.mxu1 %vm187_vm8, %v1338_v52 }
 0xc0b   :  { %2040 = vmatmul.msk.f32.vlgmr.msra.gmra.mxu1 %vm187_vm8, %v1230_v38 }
 0xc0d   :  { %1497 = vrot.lane.b32.xlu2 %v2747_v6, %s3050_s27  ;;  %s1916_s27 = sld [smem:[#allocation2]] }
 0xc11   :  { %v1336_v44 = vpop.permute.xlu1 %1335 }
 0xc13   :  { %2044 = vmatmul.msk.f32.vlgmr.msrb.gmra.mxu1 %vm187_vm8, %v1336_v44 }
 0xc19   :  { %v1472_v53 = vpop.permute.xlu1 %1471 }
 0xc1a   :  { %2049 = vmatpush.xpose.msk.msra.mxu1 %vm187_vm8, %v1472_v53 }
 0xc60   :  { %v1144_v55 = vpop.xlane.xlu0 %1143 }
 0xc61   :  { %2209 = vrcp.f32 %v1144_v55 }
 0xc67   :  { %v2210_v56 = vpop.eup %2209 }
 0xc68   :  { %v1148_v29 = vmul.f32 %v2210_v56, %v2204_v43  ;;  %v1275_v57 = vpop.xlane.xlu2 %1274 }
 0xc69   :  { %2211 = vrcp.f32 %v1275_v57 }
 0xc6a   :  { %2036 = vmatmul.msk.f32.vlgmr.msra.gmra.mxu2 %vm187_vm8, %v1148_v29  ;;  %v2119_v29 = vpack.i.bf16 %v2747_v6, %v2739_v1 }
 0xc6b   :  { %2045 = vmatpush.xpose.msk.msra.mxu2 %vm187_vm8, %v1366_v47 }
 0xc6f   :  { %v2212_v58 = vpop.eup %2211 }
 0xc70   :  { %v1281_v61 = vmul.f32 %v2212_v58, %v2206_v5  ;;  %v1498_v0 = vpop.permute.xlu2 %1497 }
 0xc72   :  { %2041 = vmatmul.msk.f32.vlgmr.msrb.gmra.mxu2 %vm187_vm8, %v1281_v61 }
 0xc73   :  { %2051 = vmatpush.xpose.msk.msrb.mxu2 %vm187_vm8, %v1500_v54  ;;  %v1470_v62 = vpop.permute.xlu0 %1469 }
 0xc74   :  { %2050 = vmatmul.msk.f32.vlgmr.msra.gmra.mxu1 %vm187_vm8, %v1470_v62 }
 0xc7a   :  { %2046 = vmatmul.msk.f32.vlgmr.msra.gmra.mxu2 %vm187_vm8, %v1364_v60 }
 0xc80   :  { %v2808_v63 = vpop.f32.mrf.mxu1 }
 0xc82   :  { %2052 = vmatmul.msk.f32.vlgmr.msrb.gmra.mxu2 %vm187_vm8, %v1498_v0 }
 0xc88   :  { %v1254_v2 = vpop.f32.mrf.mxu1 }
 0xc89   :  { %v1258_v8 = vmul.f32 0.35355338, %v1254_v2 }
 0xc8b   :  { %v1260_v9 = vsel %vm2494_vm9, %v1258_v8, -1e+30 }
 0xc8c   :  { %v1264_v11 = vsel %vm187_vm8, %v1260_v9, -inf }
 0xc8d   :  { %1265 = vmax.xlane.f32.xlu2 %v1264_v11 }
 0xc90   :  { %v1360_v12 = vpop.f32.mrf.mxu1 }
 0xc91   :  { %v1391_v14 = vmul.f32 0.35355338, %v1360_v12 }
 0xc93   :  { %v1393_v15 = vsel %vm2494_vm9, %v1391_v14, -1e+30 }
 0xc94   :  { %v1395_v16 = vsel %vm187_vm8, %v1393_v15, -inf }
 0xc95   :  { %1396 = vmax.xlane.f32.xlu1 %v1395_v16 }
 0xced   :  { %v2817_v17 = vpop.f32.mrf.mxu2 }
 0xcf1   :  { %v1494_v4 = vpop.f32.mrf.mxu1 }
 0xcf2   :  { %v1525_v19 = vmul.f32 0.35355338, %v1494_v4 }
 0xcf4   :  { %v1527_v20 = vsel %vm2494_vm9, %v1525_v19, -1e+30 }
 0xcf5   :  { %v1306_v22 = vpop.f32.mrf.mxu2  ;;  %v1529_v23 = vsel %vm187_vm8, %v1527_v20, -inf }
 0xcf6   :  { %1530 = vmax.xlane.f32.xlu2 %v1529_v23 }
 0xcfd   :  { %v1388_v24 = vpop.f32.mrf.mxu2 }
 0xcfe   :  { %v1392_v25 = vmul.f32 0.35355338, %v1388_v24 }
 0xd00   :  { %v1266_v36 = vpop.xlane.xlu2 %1265  ;;  %v1394_v26 = vsel %vm2494_vm9, %v1392_v25, -1e+30 }
 0xd01   :  { %v1268_v27 = vsub.f32 %v1260_v9, %v1266_v36  ;;  %v1398_v28 = vsel %vm187_vm8, %v1394_v26, -inf }
 0xd02   :  { %1399 = vmax.xlane.f32.xlu0 %v1398_v28  ;;  %v2056_v28 = vld [vmem:[%s3010_s7 + $0x28] sm:$0xff] }
 0xd03   :  { %v1271_v30 = vmul.f32 1.442695, %v1268_v27  ;;  %v2057_v27 = vld [vmem:[%s3010_s7 + $0x30] sm:$0xff] }
 0xd05   :  { %2213 = vpow2.f32 %v1271_v30  ;;  %v1522_v39 = vpop.f32.mrf.mxu2  ;;  %v2055_v30 = vld [vmem:[%s3010_s7 + $0x20] sm:$0xff] }
 0xd06   :  { %v1526_v31 = vmul.f32 0.35355338, %v1522_v39 }
 0xd08   :  { %v1397_v32 = vpop.xlane.xlu1 %1396  ;;  %v1528_v33 = vsel %vm2494_vm9, %v1526_v31, -1e+30 }
 0xd09   :  { %v1401_v34 = vsub.f32 %v1393_v15, %v1397_v32  ;;  %v1532_v35 = vsel %vm187_vm8, %v1528_v33, -inf }
 0xd0a   :  { %1533 = vmax.xlane.f32.xlu1 %v1532_v35 }
 0xd0b   :  { %v2214_v37 = vpop.eup %2213  ;;  %v1403_v38 = vmul.f32 1.442695, %v1401_v34 }
 0xd0c   :  { %v1276_v60 = vsel %vm187_vm8, %v2214_v37, 0.0 }
 0xd0d   :  { %2215 = vpow2.f32 %v1403_v38  ;;  %1277 = vadd.xlane.f32.xlu2 %v1276_v60 }
 0xd13   :  { %v2216_v40 = vpop.eup %2215 }
 0xd14   :  { %v1407_v41 = vsel %vm187_vm8, %v2216_v40, 0.0 }
 0xd15   :  { %1408 = vadd.xlane.f32.xlu0 %v1407_v41 }
 0xd23   :  { %1309 = vrot.lane.b32.xlu1 %v2747_v6, %s2296_s29  ;;  %s3052_s29 = smov 48  }
 0xd2b   :  { %1605 = vrot.lane.b32.xlu1 %v1306_v22, %s3051_s19 }
 0xd69   :  { %v1531_v10 = vpop.xlane.xlu2 %1530 }
 0xd6a   :  { %v1535_v59 = vsub.f32 %v1527_v20, %v1531_v10 }
 0xd6c   :  { %v1537_v42 = vmul.f32 1.442695, %v1535_v59 }
 0xd6e   :  { %2217 = vpow2.f32 %v1537_v42 }
 0xd74   :  { %v2218_v3 = vpop.eup %2217 }
 0xd75   :  { %v1400_v43 = vpop.xlane.xlu0 %1399  ;;  %v1541_v45 = vsel %vm187_vm8, %v2218_v3, 0.0 }
 0xd76   :  { %v1402_v46 = vsub.f32 %v1394_v26, %v1400_v43  ;;  %1542 = vadd.xlane.f32.xlu0 %v1541_v45  ;;  %v2058_v26 = vld [vmem:[%s3010_s7 + $0x38] sm:$0xff] }
 0xd77   :  { %1661 = vmatpush.msrb.mxu1 %v2058_v26 }
 0xd78   :  { %v1405_v47 = vmul.f32 1.442695, %v1402_v46 }
 0xd79   :  { %1662 = vmatpush.msrb.mxu1 %v2057_v27 }
 0xd7a   :  { %2219 = vpow2.f32 %v1405_v47 }
 0xd7b   :  { %1663 = vmatpush.msrb.mxu1 %v2056_v28 }
 0xd7d   :  { %v1534_v5 = vpop.xlane.xlu1 %1533  ;;  %1664 = vmatpush.msrb.mxu1 %v2055_v30 }
 0xd7e   :  { %v1536_v48 = vsub.f32 %v1528_v33, %v1534_v5 }
 0xd80   :  { %v2220_v49 = vpop.eup %2219  ;;  %v1539_v50 = vmul.f32 1.442695, %v1536_v48  ;;  %v1278_v44 = vpop.xlane.xlu2 %1277 }
 0xd81   :  { %v1410_v51 = vsel %vm187_vm8, %v2220_v49, 0.0 }
 0xd82   :  { %2221 = vpow2.f32 %v1539_v50  ;;  %1411 = vadd.xlane.f32.xlu2 %v1410_v51 }
 0xd83   :  { %2223 = vrcp.f32 %v1278_v44 }
 0xd88   :  { %v2222_v52 = vpop.eup %2221  ;;  %v1409_v57 = vpop.xlane.xlu0 %1408 }
 0xd89   :  { %v1544_v53 = vsel %vm187_vm8, %v2222_v52, 0.0  ;;  %v2224_v54 = vpop.eup %2223  ;;  %2225 = vrcp.f32 %v1409_v57 }
 0xd8a   :  { %1545 = vadd.xlane.f32.xlu0 %v1544_v53  ;;  %v1282_v55 = vmul.f32 %v2224_v54, %v2214_v37  ;;  %v2067_v54 = vld [vmem:[%s3014_s11 + $0x38] sm:$0xff] }
 0xd8b   :  { %1760 = vmatpush.msra.mxu2 %v2067_v54 }
 0xd8f   :  { %v2226_v61 = vpop.eup %2225 }
 0xd90   :  { %v1415_v11 = vmul.f32 %v2226_v61, %v2216_v40 }
 0xd95   :  { %v1310_v56 = vpop.permute.xlu1 %1309 }
 0xd96   :  { %1330 = vmatpush.msra.mxu0 %v1310_v56  ;;  %v2065_v56 = vld [vmem:[%s3014_s11 + $0x28] sm:$0xff] }
 0xd97   :  { %2042 = vmatmul.msk.f32.vlgmr.msra.gmra.mxu0 %vm187_vm8, %v1282_v55  ;;  %v2066_v55 = vld [vmem:[%s3014_s11 + $0x30] sm:$0xff] }
 0xd98   :  { %1761 = vmatpush.msra.mxu2 %v2066_v55 }
 0xd9a   :  { %2120 = vrot.lane.b32.xlu2 %v2119_v29, %s3052_s29  ;;  %1762 = vmatpush.msra.mxu2 %v2065_v56 }
 0xd9d   :  { %v1606_v39 = vpop.permute.xlu1 %1605 }
 0xd9e   :  { %2125 = vrot.lane.b32.xlu0 %v2119_v29, %s3053_s20  ;;  %v1627_v32 = vsel %vm187_vm8, %v2808_v63, %v1606_v39  ;;  %v2140_v63 = vld [vmem:[%s3011_s8 + $0x1] ss:$0 sm:$0xff]  ;;  %s2090_s20 = sld [smem:[#allocation2 + $0x1]] }
 0xd9f   :  { %v2064_v29 = vld [vmem:[%s3014_s11 + $0x20] sm:$0xff] }
 0xda0   :  { %1763 = vmatpush.msra.mxu2 %v2064_v29 }
 0xde9   :  { %v1543_v2 = vpop.xlane.xlu0 %1542 }
 0xdf5   :  { %v1412_v58 = vpop.xlane.xlu2 %1411 }
 0xdf6   :  { %2227 = vrcp.f32 %v1412_v58 }
 0xdf7   :  { %2229 = vrcp.f32 %v1543_v2 }
 0xdfc   :  { %v2228_v62 = vpop.eup %2227 }
 0xdfd   :  { %v2121_v0 = vpop.permute.xlu2 %2120  ;;  %v1416_v12 = vmul.f32 %v2228_v62, %v2220_v49  ;;  %v1546_v1 = vpop.xlane.xlu0 %1545 }
 0xdfe   :  { %v2123_v8 = vunpack.i.h.bf16 %v2121_v0  ;;  %v2122_v9 = vunpack.i.l.bf16 %v2121_v0  ;;  %2231 = vrcp.f32 %v1546_v1  ;;  %v2230_v6 = vpop.eup %2229 }
 0xdff   :  { %v1549_v19 = vmul.f32 %v2230_v6, %v2218_v3 }
 0xe00   :  { %1438 = vmatpush.msrb.mxu0 %v2122_v9  ;;  %1464 = vmatpush.msrb.mxu3 %v2123_v8 }
 0xe01   :  { %2047 = vmatmul.msk.f32.vlgmr.msrb.gmra.mxu0 %vm187_vm8, %v1415_v11  ;;  %2048 = vmatmul.msk.f32.vlgmr.msrb.gmra.mxu3 %vm187_vm8, %v1416_v12 }
 0xe04   :  { %v2232_v14 = vpop.eup %2231 }
 0xe05   :  { %v1550_v20 = vmul.f32 %v2232_v14, %v2222_v52 }
 0xe10   :  { %v2126_v15 = vpop.permute.xlu0 %2125 }
 0xe11   :  { %v2128_v16 = vunpack.i.h.bf16 %v2126_v15  ;;  %v2127_v4 = vunpack.i.l.bf16 %v2126_v15 }
 0xe13   :  { %1572 = vmatpush.msra.mxu0 %v2127_v4  ;;  %1598 = vmatpush.msra.mxu3 %v2128_v16  ;;  %v2141_v16 = vld [vmem:[%s3012_s9 + $0x1] ss:$0 sm:$0xff]  ;;  %s1980_s9 = sshll.u32 %s3021_s18, 4  ;;  %s1981_s9 = int_to_ptr.hbm [resolvable:$true] %s1980_s9 }
 0xe14   :  { %v1332_v22 = vpop.f32.mrf.mxu0  ;;  %2053 = vmatmul.msk.f32.vlgmr.msra.gmra.mxu0 %vm187_vm8, %v1549_v19  ;;  %2054 = vmatmul.msk.f32.vlgmr.msra.gmra.mxu3 %vm187_vm8, %v1550_v20 }
 0xe15   :  { %1607 = vrot.lane.b32.xlu0 %v1332_v22, %s3051_s19  ;;  %v2142_v22 = vld [vmem:[%s3013_s10 + $0x1] ss:$0 sm:$0xff] }
 0xe7e   :  { %v1440_v23 = vpop.f32.mrf.mxu0 }
 0xe7f   :  { %1613 = vrot.lane.b32.xlu1 %v1440_v23, %s3054_s22 }
 0xe84   :  { %v1466_v24 = vpop.f32.mrf.mxu3 }
 0xe87   :  { %1615 = vrot.lane.b32.xlu1 %v1466_v24, %s3054_s22  ;;  %v1608_v37 = vpop.permute.xlu0 %1607 }
 0xe88   :  { %v1628_v38 = vsel %vm187_vm8, %v2817_v17, %v1608_v37  ;;  %v2083_v37 = vld [vmem:[%s3016_s13 + $0xd0] sm:$0xff] }
 0xe91   :  { %v1574_v25 = vpop.f32.mrf.mxu0 }
 0xe92   :  { %1621 = vrot.lane.b32.xlu2 %v1574_v25, %s3055_s2 }
 0xe97   :  { %v1600_v36 = vpop.f32.mrf.mxu3 }
 0xe9a   :  { %1623 = vrot.lane.b32.xlu2 %v1600_v36, %s3055_s2 }
 0xeec   :  { %v1622_v31 = vpop.permute.xlu2 %1621 }
 0xef1   :  { %v1614_v33 = vpop.permute.xlu1 %1613 }
 0xef2   :  { %v1629_v34 = vsel %vm747_vm10, %v1627_v32, %v1614_v33  ;;  %v2087_v32 = vld [vmem:[%s3016_s13 + $0xf0] sm:$0xff]  ;;  %v2086_v33 = vld [vmem:[%s3016_s13 + $0xe8] sm:$0xff] }
 0xef3   :  { %v1631_v35 = vsel %vm750_vm11, %v1629_v34, %v1622_v31  ;;  %v2088_v31 = vld [vmem:[%s3016_s13 + $0xf8] sm:$0xff]  ;;  %v2085_v34 = vld [vmem:[%s3016_s13 + $0xe0] sm:$0xff] }
 0xef4   :  { %2060 = vmatmul.msk.f32.vlgmr.msrb.gmra.mxu1 %vm85_vm0, %v1631_v35  ;;  %v1624_v40 = vpop.permute.xlu2 %1623  ;;  %1835 = vmatpush.msrb.mxu0 %v2088_v31  ;;  %v2084_v35 = vld [vmem:[%s3016_s13 + $0xd8] sm:$0xff] }
 0xef6   :  { %1836 = vmatpush.msrb.mxu0 %v2087_v32 }
 0xef8   :  { %1837 = vmatpush.msrb.mxu0 %v2086_v33 }
 0xef9   :  { %v1616_v60 = vpop.permute.xlu1 %1615 }
 0xefa   :  { %v1630_v41 = vsel %vm747_vm10, %v1628_v38, %v1616_v60  ;;  %1838 = vmatpush.msrb.mxu0 %v2085_v34  ;;  %v2082_v38 = vld [vmem:[%s3016_s13 + $0xc8] sm:$0xff]  ;;  %v2081_v60 = vld [vmem:[%s3016_s13 + $0xc0] sm:$0xff] }
 0xefb   :  { %v1632_v10 = vsel %vm750_vm11, %v1630_v41, %v1624_v40  ;;  %v2080_v40 = vld [vmem:[%s3016_s13 + $0xb8] sm:$0xff]  ;;  %v2079_v41 = vld [vmem:[%s3016_s13 + $0xb0] sm:$0xff] }
 0xefc   :  { %2061 = vmatmul.msk.f32.gmra.mxu1 %vm85_vm0, %v1632_v10  ;;  %1839 = vmatpush.msrb.mxu0 %v2084_v35  ;;  %v2078_v10 = vld [vmem:[%s3016_s13 + $0xa8] sm:$0xff] }
 0xefe   :  { %1840 = vmatpush.msrb.mxu0 %v2083_v37 }
 0xf00   :  { %1841 = vmatpush.msrb.mxu0 %v2082_v38 }
 0xf02   :  { %1842 = vmatpush.msrb.mxu0 %v2081_v60 }
 0xf04   :  { %1843 = vmatpush.msrb.mxu0 %v2080_v40 }
 0xf06   :  { %1844 = vmatpush.msrb.mxu0 %v2079_v41 }
 0xf08   :  { %1845 = vmatpush.msrb.mxu0 %v2078_v10 }
 0xf71   :  { %v1666_v59 = vpop.f32.mrf.mxu1 }
 0xf72   :  { %v1667_v42 = vadd.f32 %v2140_v63, %v1666_v59  ;;  %v2076_v59 = vld [vmem:[%s3016_s13 + $0x98] sm:$0xff] }
 0xf74   :  { %v2876_v3 = vadd.f32 %v1667_v42, %v2699_v18  ;;  %v2143_v42 = vld [vmem:[%s3015_s12 + $0x1] ss:$0 sm:$0xff] }
 0xf76   :  { %v1678_v17 = vsel %vm85_vm0, %v2876_v3, 0.0 }
 0xf77   :  { %1679 = vadd.xlane.f32.xlu0 %v1678_v17  ;;  %v2075_v17 = vld [vmem:[%s3016_s13 + $0x90] sm:$0xff] }
 0xf79   :  { %v1669_v43 = vpop.f32.mrf.mxu1 }
 0xf7a   :  { %v1670_v45 = vadd.f32 %v2140_v63, %v1669_v43  ;;  %v2077_v63 = vld [vmem:[%s3016_s13 + $0xa0] sm:$0xff] }
 0xf7b   :  { %1846 = vmatpush.msrb.mxu0 %v2077_v63  ;;  %v1947_v63 = vld [vmem:[%s3020_s17 + $0x18] sm:$0xff] }
 0xf7c   :  { %v2881_v46 = vadd.f32 %v1670_v45, %v2704_v21  ;;  %v2074_v45 = vld [vmem:[%s3016_s13 + $0x88] sm:$0xff]  ;;  %1963 = vmatpush.msrb.mxu3 %v1947_v63 }
 0xf7d   :  { %1847 = vmatpush.msrb.mxu0 %v2076_v59  ;;  %v1946_v59 = vld [vmem:[%s3020_s17 + $0x10] sm:$0xff] }
 0xf7e   :  { %v1681_v47 = vsel %vm85_vm0, %v2881_v46, 0.0  ;;  %1964 = vmatpush.msrb.mxu3 %v1946_v59 }
 0xf7f   :  { %1682 = vadd.xlane.f32.xlu1 %v1681_v47  ;;  %1848 = vmatpush.msrb.mxu0 %v2075_v17 }
 0xf81   :  { %1849 = vmatpush.msrb.mxu0 %v2074_v45  ;;  %v1944_v45 = vld [vmem:[%s3020_s17] sm:$0xff] }
 0xfea   :  { %v1680_v5 = vpop.xlane.xlu0 %1679 }
 0xfeb   :  { %v1684_v48 = vmul.f32 %v1680_v5, %v2421_v13  ;;  %v2073_v5 = vld [vmem:[%s3016_s13 + $0x80] sm:$0xff] }
 0xfec   :  { %1850 = vmatpush.msrb.mxu0 %v2073_v5 }
 0xfed   :  { %v1686_v49 = vsub.f32 %v2876_v3, %v1684_v48 }
 0xfef   :  { %v1688_v18 = vmul.f32 %v1686_v49, %v1686_v49 }
 0xff1   :  { %v1690_v50 = vsel %vm85_vm0, %v1688_v18, 0.0 }
 0xff2   :  { %1691 = vadd.xlane.f32.xlu2 %v1690_v50  ;;  %v1683_v51 = vpop.xlane.xlu1 %1682 }
 0xff3   :  { %v1685_v52 = vmul.f32 %v1683_v51, %v2421_v13 }
 0xff5   :  { %v1687_v44 = vsub.f32 %v2881_v46, %v1685_v52 }
 0xff7   :  { %v1689_v21 = vmul.f32 %v1687_v44, %v1687_v44 }
 0xff9   :  { %v1693_v53 = vsel %vm85_vm0, %v1689_v21, 0.0 }
 0xffa   :  { %1694 = vadd.xlane.f32.xlu0 %v1693_v53 }
0x1065   :  { %v1692_v57 = vpop.xlane.xlu2 %1691 }
0x1066   :  { %v1696_v58 = vmul.f32 %v1692_v57, %v2421_v13 }
0x1068   :  { %v1698_v61 = vadd.f32 1e-05, %v1696_v58 }
0x106a   :  { %2233 = vrsqrt.f32 %v1698_v61  ;;  %vm1706_vm9 = vweird.f32 %v1698_v61 }
0x106d   :  { %v1695_v62 = vpop.xlane.xlu0 %1694 }
0x106e   :  { %v1697_v0 = vmul.f32 %v1695_v62, %v2421_v13 }
0x1070   :  { %v2234_v2 = vpop.eup %2233  ;;  %v1699_v8 = vadd.f32 1e-05, %v1697_v0 }
0x1071   :  { %v1701_v9 = vmul.f32 %v2234_v2, %v1698_v61  ;;  %vm1707_vm8 = vweird.f32 %v2234_v2 }
0x1072   :  { %2235 = vrsqrt.f32 %v1699_v8  ;;  %vm1708_vm10 = vmor %vm1706_vm9, %vm1707_vm8  ;;  %vm1716_vm6 = vweird.f32 %v1699_v8 }
0x1073   :  { %v1702_v11 = vmul.f32 %v2234_v2, %v1701_v9 }
0x1075   :  { %v1703_v12 = vmul.f32 0.5, %v1702_v11 }
0x1077   :  { %v1704_v1 = vsub.f32 1.5, %v1703_v12 }
0x1078   :  { %v2236_v6 = vpop.eup %2235 }
0x1079   :  { %v1705_v14 = vmul.f32 %v2234_v2, %v1704_v1  ;;  %v1711_v15 = vmul.f32 %v2236_v6, %v1699_v8  ;;  %vm1717_vm11 = vweird.f32 %v2236_v6 }
0x107a   :  { %vm1718_vm7 = vmor %vm1716_vm6, %vm1717_vm11 }
0x107b   :  { %v1709_v4 = vsel %vm1708_vm10, %v2234_v2, %v1705_v14  ;;  %v1712_v19 = vmul.f32 %v2236_v6, %v1711_v15 }
0x107c   :  { %v1720_v20 = vmul.f32 %v1709_v4, %v1686_v49 }
0x107d   :  { %v1713_v23 = vmul.f32 0.5, %v1712_v19 }
0x107e   :  { %v1725_v24 = vmul.f32 %v2141_v16, %v1720_v20 }
0x107f   :  { %v1714_v25 = vsub.f32 1.5, %v1713_v23  ;;  %v2144_v23 = vld [vmem:[%s3017_s14 + $0x1] ss:$0 sm:$0xff] }
0x1080   :  { %v1730_v36 = vadd.f32 %v2142_v22, %v1725_v24 }
0x1081   :  { %v1715_v26 = vmul.f32 %v2236_v6, %v1714_v25 }
0x1082   :  { %2069 = vmatmul.msk.f32.vlgmr.msra.gmra.mxu2 %vm85_vm0, %v1730_v36 }
0x1083   :  { %v1719_v27 = vsel %vm1718_vm7, %v2236_v6, %v1715_v26 }
0x1084   :  { %v1721_v28 = vmul.f32 %v1719_v27, %v1687_v44 }
0x1086   :  { %v1726_v30 = vmul.f32 %v2141_v16, %v1721_v28 }
0x1088   :  { %v1731_v39 = vadd.f32 %v2142_v22, %v1726_v30 }
0x108a   :  { %2070 = vmatmul.msk.f32.gmra.mxu2 %vm85_vm0, %v1731_v39 }
0x1105   :  { %v1765_v43 = vpop.f32.mrf.mxu2 }
0x1106   :  { %v1766_v47 = vadd.f32 %v2143_v42, %v1765_v43 }
0x1108   :  { %v2071_v48 = vmul.f32 -1.702, %v1766_v47 }
0x110a   :  { %v1775_v49 = vmul.f32 1.442695, %v2071_v48 }
0x110c   :  { %2237 = vpow2.f32 %v1775_v49 }
0x110d   :  { %v1768_v18 = vpop.f32.mrf.mxu2 }
0x110e   :  { %v1769_v50 = vadd.f32 %v2143_v42, %v1768_v18  ;;  %v1945_v42 = vld [vmem:[%s3020_s17 + $0x8] sm:$0xff] }
0x110f   :  { %1965 = vmatpush.msrb.mxu3 %v1945_v42 }
0x1110   :  { %v2072_v51 = vmul.f32 -1.702, %v1769_v50 }
0x1111   :  { %1966 = vmatpush.msrb.mxu3 %v1944_v45 }
0x1112   :  { %v2238_v52 = vpop.eup %2237  ;;  %v1777_v44 = vmul.f32 1.442695, %v2072_v51 }
0x1113   :  { %v1779_v21 = vadd.f32 1.0, %v2238_v52 }
0x1114   :  { %2239 = vpow2.f32 %v1777_v44 }
0x1115   :  { %2241 = vrcp.f32 %v1779_v21  ;;  %v1792_v57 = vand.u32 2147483648, %v1779_v21  ;;  %v1790_v61 = vand.u32 2147483647, %v1779_v21  ;;  %vm1786_vm13 = vweird.f32 %v1779_v21 }
0x1117   :  { %v1793_v2 = vor.u32 1.1754944e-38, %v1792_v57  ;;  %vm1791_vm15 = vcmp.eq.f32.partialorder %v1790_v61, 8.507059e+37 }
0x111a   :  { %v2240_v53 = vpop.eup %2239 }
0x111b   :  { %v2242_v54 = vpop.eup %2241  ;;  %v1780_v55 = vadd.f32 1.0, %v2240_v53 }
0x111c   :  { %v1782_v56 = vmul.f32 %v2242_v54, %v1779_v21  ;;  %vm1787_vm12 = vweird.f32 %v2242_v54 }
0x111d   :  { %2243 = vrcp.f32 %v1780_v55  ;;  %vm1788_vm14 = vmor %vm1786_vm13, %vm1787_vm12  ;;  %v1807_v6 = vand.u32 2147483648, %v1780_v55  ;;  %v1805_v15 = vand.u32 2147483647, %v1780_v55  ;;  %vm1801_vm2 = vweird.f32 %v1780_v55 }
0x111e   :  { %v1783_v29 = vsub.f32 1.0, %v1782_v56  ;;  %vm1942_vm13 = vcmask 1040384  }
0x111f   :  { %v1808_v4 = vor.u32 1.1754944e-38, %v1807_v6  ;;  %vm1806_vm4 = vcmp.eq.f32.partialorder %v1805_v15, 8.507059e+37 }
0x1120   :  { %v1784_v58 = vmul.f32 %v2242_v54, %v1783_v29 }
0x1122   :  { %v1785_v62 = vadd.f32 %v2242_v54, %v1784_v58 }
0x1123   :  { %v2244_v0 = vpop.eup %2243 }
0x1124   :  { %v1789_v8 = vsel %vm1788_vm14, %v2242_v54, %v1785_v62  ;;  %v1797_v9 = vmul.f32 %v2244_v0, %v1780_v55  ;;  %vm1802_vm1 = vweird.f32 %v2244_v0  ;;  %v2146_v54 = vld [vmem:[%s3019_s16] ss:$0 sm:$0xff]  ;;  %v1917_v55 = vstv %s1916_s27 }
0x1125   :  { %v1794_v11 = vsel %vm1791_vm15, %v1793_v2, %v1789_v8  ;;  %vm1803_vm3 = vmor %vm1801_vm2, %vm1802_vm1  ;;  %vm1918_vm10 = vcmp.eq.s32.totalorder %v2491_v7, %v1917_v55  ;;  %vm1971_vm14 = vcmask 123904  }
0x1126   :  { %v1811_v12 = vmul.f32 %v1794_v11, %v1766_v47  ;;  %v1798_v1 = vsub.f32 1.0, %v1797_v9  ;;  %v1930_v9 = vstv %s2090_s20 }
0x1127   :  { %vm1931_vm12 = vcmp.eq.s32.totalorder %v2491_v7, %v1930_v9 }
0x1128   :  { %1851 = vmatmul.f32.vlgmr.msrb.gmra.mxu0 %v1811_v12  ;;  %v1799_v14 = vmul.f32 %v2244_v0, %v1798_v1 }
0x112a   :  { %v1800_v16 = vadd.f32 %v2244_v0, %v1799_v14 }
0x112c   :  { %v1804_v19 = vsel %vm1803_vm3, %v2244_v0, %v1800_v16 }
0x112d   :  { %v1809_v20 = vsel %vm1806_vm4, %v1808_v4, %v1804_v19 }
0x112e   :  { %v1812_v22 = vmul.f32 %v1809_v20, %v1769_v50 }
0x1130   :  { %1854 = vmatmul.f32.gmra.mxu0 %v1812_v22 }
0x11a5   :  { %v1852_v24 = vpop.f32.mrf.mxu0 }
0x11a6   :  { %v1853_v25 = vadd.f32 %v2144_v23, %v1852_v24 }
0x11a8   :  { %v1858_v36 = vadd.f32 %v1853_v25, %v2876_v3 }
0x11aa   :  { %v1862_v26 = vsel %vm85_vm0, %v1858_v36, 0.0 }
0x11ab   :  { %1863 = vadd.xlane.f32.xlu2 %v1862_v26 }
0x11ad   :  { %v1855_v27 = vpop.f32.mrf.mxu0 }
0x11ae   :  { %v1856_v28 = vadd.f32 %v2144_v23, %v1855_v27 }
0x11b0   :  { %v1859_v30 = vadd.f32 %v1856_v28, %v2881_v46 }
0x11b2   :  { %v1865_v39 = vsel %vm85_vm0, %v1859_v30, 0.0 }
0x11b3   :  { %1866 = vadd.xlane.f32.xlu1 %v1865_v39 }
0x121e   :  { %v1864_v31 = vpop.xlane.xlu2 %1863 }
0x121f   :  { %v1868_v32 = vmul.f32 %v1864_v31, %v2421_v13 }
0x1221   :  { %v1870_v33 = vsub.f32 %v1858_v36, %v1868_v32 }
0x1223   :  { %v1872_v34 = vmul.f32 %v1870_v33, %v1870_v33 }
0x1225   :  { %v1874_v35 = vsel %vm85_vm0, %v1872_v34, 0.0 }
0x1226   :  { %v1867_v37 = vpop.xlane.xlu1 %1866  ;;  %1875 = vadd.xlane.f32.xlu0 %v1874_v35 }
0x1227   :  { %v1869_v3 = vmul.f32 %v1867_v37, %v2421_v13 }
0x1229   :  { %v1871_v38 = vsub.f32 %v1859_v30, %v1869_v3 }
0x122b   :  { %v1873_v60 = vmul.f32 %v1871_v38, %v1871_v38 }
0x122d   :  { %v1877_v40 = vsel %vm85_vm0, %v1873_v60, 0.0 }
0x122e   :  { %1878 = vadd.xlane.f32.xlu2 %v1877_v40 }
0x1299   :  { %v1876_v46 = vpop.xlane.xlu0 %1875 }
0x129a   :  { %v1880_v41 = vmul.f32 %v1876_v46, %v2421_v13 }
0x129c   :  { %v1882_v10 = vadd.f32 1e-05, %v1880_v41 }
0x129e   :  { %2245 = vrsqrt.f32 %v1882_v10  ;;  %vm1890_vm8 = vweird.f32 %v1882_v10 }
0x12a1   :  { %v1879_v17 = vpop.xlane.xlu2 %1878 }
0x12a2   :  { %v1881_v43 = vmul.f32 %v1879_v17, %v2421_v13  ;;  %v2145_v13 = vld [vmem:[%s3018_s15] ss:$0 sm:$0xff]  ;;  %s2305_s15 = smov [#allocation5]  }
0x12a3   :  { %s1978_s16 = sshll.u32 %s2305_s15, 4  ;;  %s1979_s16 = int_to_ptr.vmem [resolvable:$true] %s1978_s16 }
0x12a4   :  { %v2246_v47 = vpop.eup %2245  ;;  %v1883_v5 = vadd.f32 1e-05, %v1881_v43 }
0x12a5   :  { %v1885_v48 = vmul.f32 %v2246_v47, %v1882_v10  ;;  %vm1891_vm5 = vweird.f32 %v2246_v47 }
0x12a6   :  { %2247 = vrsqrt.f32 %v1883_v5  ;;  %vm1892_vm9 = vmor %vm1890_vm8, %vm1891_vm5  ;;  %vm1900_vm6 = vweird.f32 %v1883_v5 }
0x12a7   :  { %v1886_v49 = vmul.f32 %v2246_v47, %v1885_v48 }
0x12a9   :  { %v1887_v18 = vmul.f32 0.5, %v1886_v49 }
0x12ab   :  { %v1888_v50 = vsub.f32 1.5, %v1887_v18 }
0x12ac   :  { %v2248_v51 = vpop.eup %2247 }
0x12ad   :  { %v1889_v52 = vmul.f32 %v2246_v47, %v1888_v50  ;;  %v1895_v44 = vmul.f32 %v2248_v51, %v1883_v5  ;;  %vm1901_vm11 = vweird.f32 %v2248_v51 }
0x12ae   :  { %vm1902_vm7 = vmor %vm1900_vm6, %vm1901_vm11 }
0x12af   :  { %v1893_v21 = vsel %vm1892_vm9, %v2246_v47, %v1889_v52  ;;  %v1896_v53 = vmul.f32 %v2248_v51, %v1895_v44 }
0x12b0   :  { %v1904_v56 = vmul.f32 %v1893_v21, %v1870_v33 }
0x12b1   :  { %v1897_v29 = vmul.f32 0.5, %v1896_v53 }
0x12b2   :  { %v1909_v57 = vmul.f32 %v2145_v13, %v1904_v56 }
0x12b3   :  { %v1898_v58 = vsub.f32 1.5, %v1897_v29 }
0x12b4   :  { %v1914_v61 = vadd.f32 %v2146_v54, %v1909_v57 }
0x12b5   :  { %v1899_v62 = vmul.f32 %v2248_v51, %v1898_v58 }
0x12b6   :  { %v1921_v0 = vsel %vm1918_vm10, %v1914_v61, 0.0 }
0x12b7   :  { %v1903_v2 = vsel %vm1902_vm7, %v2248_v51, %v1899_v62  ;;  %v1922_v8 = vsel %vm85_vm0, %v1921_v0, 0.0 }
0x12b8   :  { %v1905_v11 = vmul.f32 %v1903_v2, %v1871_v38  ;;  %v1923_v12 = vrot.slane %v1922_v8, 4 }
0x12ba   :  { %v1910_v1 = vmul.f32 %v2145_v13, %v1905_v11  ;;  %v1924_v6 = vadd.f32 %v1923_v12, %v1922_v8 }
0x12bc   :  { %v1915_v14 = vadd.f32 %v2146_v54, %v1910_v1  ;;  %v1925_v16 = vrot.slane %v1924_v6, 2 }
0x12be   :  { %v1934_v15 = vsel %vm1931_vm12, %v1915_v14, 0.0  ;;  %v1926_v20 = vadd.f32 %v1925_v16, %v1924_v6 }
0x12bf   :  { %v1935_v4 = vsel %vm85_vm0, %v1934_v15, 0.0 }
0x12c0   :  { %v1936_v19 = vrot.slane %v1935_v4, 4  ;;  %v1927_v24 = vrot.slane %v1926_v20, 1 }
0x12c2   :  { %v1937_v22 = vadd.f32 %v1936_v19, %v1935_v4  ;;  %v1928_v26 = vadd.f32 %v1927_v24, %v1926_v20 }
0x12c4   :  { %v1938_v23 = vrot.slane %v1937_v22, 2 }
0x12c6   :  { %v1939_v25 = vadd.f32 %v1938_v23, %v1937_v22 }
0x12c8   :  { %v1940_v36 = vrot.slane %v1939_v25, 1 }
0x12ca   :  { %v1941_v27 = vadd.f32 %v1940_v36, %v1939_v25 }
0x12cc   :  { %v1943_v28 = vsel %vm1942_vm13, %v1928_v26, %v1941_v27 }
0x12cd   :  { %2091 = vmatmul.msk.f32.vlgmr.msrb.gmra.mxu3 %vm85_vm0, %v1943_v28 }
0x1350   :  { %v1968_v7 = vpop.f32.mrf.mxu3 }
0x1351   :  { %1972 = vst.msk [vmem:[#allocation5] sm:$0x3] %vm1971_vm14, %v1968_v7 }
0x1352   :  { %1983 = dma.vmem_to_hbm [thread:$0]  %s1979_s16, 32, %s1981_s9, [#allocation3]  }
0x1353   :  { %2287 = dma.done.wait [#allocation3], 32  }
0x1354   :  { %2288 = vsyncadd [#allocation3], 4294967264 }
0x1355   :  { %1988 = vsyncpa [#allocation3], 1 }
0x1356   :  { %1989 = vsyncpa [#allocation4], 1 }

</bundles_post_ra>
